<compile_context>
chip_gen: v7x
topology: tpu7x:2x2x1
jax: 0.10.0
libtpu: 0.0.40
codegen_flags: <defaults>
</compile_context>

<pallas_src>
import functools

import jax
import jax.numpy as jnp
from jax.experimental import pallas as pl
from jax.experimental.pallas import tpu as pltpu


OF1 = 512          # conv1 output channels
H1 = 256           # mlp1 output
H2 = 256           # mlp2 output
NUM_CLASS = 8      # args.density_num_class
NC_PAD = 128       # class dim padded to a full lane group (lane-dense output)
PERGROUP = 0.05    # args.pergroup
NEG_BIG = -1e9     # bias for padded classes -> softmax weight exactly 0


def _density_kernel(x_ref,
                    wc_ref, t1_ref,        # conv1 weight (BN1 scale folded), BN1 shift
                    w1_ref, t2_ref,        # mlp1 weight (BN2 scale folded), BN2 shift
                    w2_ref, b2_ref,        # mlp2 weight (BN3 scale folded), bias*s3+t3
                    w3_ref, b3_ref,        # mlp3 weight/bias padded to 128 classes
                    p_ref):
    f32 = jnp.float32
    bf16 = jnp.bfloat16

    # conv1 (1x1) -> bn1(eval, scale pre-folded) -> relu   [dropout = identity]
    h = jnp.dot(x_ref[...], wc_ref[...], preferred_element_type=f32)
    h = jnp.maximum(h + t1_ref[...], 0.0)

    # mlp1: Linear(512,256,bias=False) -> BN -> relu       [dropout = identity]
    h = jnp.dot(h.astype(bf16), w1_ref[...], preferred_element_type=f32)
    h = jnp.maximum(h + t2_ref[...], 0.0)

    # mlp2: Linear(256,256,bias=True) -> BN -> relu        [dropout = identity]
    h = jnp.dot(h.astype(bf16), w2_ref[...], preferred_element_type=f32)
    h = jnp.maximum(h + b2_ref[...], 0.0)

    # mlp3: Linear(256, num_class) padded to 128 lanes; padded classes carry a
    # huge negative bias so exp underflows to 0 and softmax over the first 8
    # columns is exactly the softmax over the real classes.
    logits = jnp.dot(h.astype(bf16), w3_ref[...], preferred_element_type=f32)
    logits = logits + b3_ref[...]

    m = jnp.max(logits, axis=-1, keepdims=True)
    e = jnp.exp(logits - m)
    inv = pl.reciprocal(jnp.sum(e, axis=-1, keepdims=True), approx=True)
    p_ref[...] = (e * inv).astype(p_ref.dtype)


def _round_up(x, m):
    return ((x + m - 1) // m) * m


@functools.partial(jax.jit, static_argnames=("tm",))
def density_prediction_forward(x_bcn, kernel_params, wfc2, tm=512):
    """x_bcn: (B, input_size, N) float32 (PyTorch NCL conv layout)."""
    (wc, t1, w1, t2, w2, b2, w3, b3) = kernel_params
    B, cin, N = x_bcn.shape
    M = B * N

    # glue: permute(0,2,1).reshape(-1, feat)  ==  rows layout (B*N, cin)
    x_rows = jnp.transpose(x_bcn, (0, 2, 1)).reshape(M, cin).astype(jnp.bfloat16)

    # Row tile: large enough to amortize the ~0.35us per-step pipeline
    # overhead, but capped so the grid keeps >= 2 steps when M allows
    # (v7x has two TensorCores sharded over the parallel grid axis).
    tm_eff = max(128, min(tm, _round_up(max((M + 1) // 2, 1), 128)))
    m_pad = _round_up(M, tm_eff)
    x_rows = jnp.pad(x_rows, ((0, m_pad - M), (0, 0)))

    grid = (m_pad // tm_eff,)
    row_spec = pl.BlockSpec((tm_eff, cin), lambda i: (i, 0))
    # Constant index_map -> the pipeline only DMAs these blocks once (the block
    # index never changes, so no re-fetch across grid steps).
    const = lambda arr: pl.BlockSpec(arr.shape, lambda i: (0, 0))

    weight_bytes = sum(int(a.size) * a.dtype.itemsize for a in kernel_params)
    cost = pl.CostEstimate(
        flops=2 * m_pad * (cin * OF1 + OF1 * H1 + H1 * H2 + H2 * NC_PAD),
        transcendentals=m_pad * (NC_PAD + 1),            # exp + approx reciprocal
        bytes_accessed=(m_pad * cin * 2                  # bf16 input rows
                        + m_pad * NC_PAD * 4             # f32 softmax output
                        + weight_bytes),
    )

    p_pad = pl.pallas_call(
        _density_kernel,
        out_shape=jax.ShapeDtypeStruct((m_pad, NC_PAD), jnp.float32),
        grid_spec=pltpu.PrefetchScalarGridSpec(
            num_scalar_prefetch=0,
            grid=grid,
            in_specs=[row_spec,
                      const(wc), const(t1),
                      const(w1), const(t2),
                      const(w2), const(b2),
                      const(w3), const(b3)],
            out_specs=pl.BlockSpec((tm_eff, NC_PAD), lambda i: (i, 0)),
        ),
        compiler_params=pltpu.CompilerParams(
            dimension_semantics=("parallel",)),
        cost_estimate=cost,
    )(x_rows, wc, t1, w1, t2, w2, b2, w3, b3)

    p_vec = p_pad[:M, :NUM_CLASS]
    # Frozen fc2 (num_class -> 1): an 8-wide dot, trivially cheap.  Kept in the
    # XLA wrapper so the kernel outputs stay lane-dense (no (tm,1) masked vst).
    density = jnp.sum(p_vec * wfc2, axis=-1)
    return p_vec, density


def _fold_bn(gamma, beta, mean, var, eps=1e-5):
    scale = gamma / jnp.sqrt(var + eps)
    shift = beta - mean * scale
    return scale, shift


def make_raw_params(key, input_size):
    """Deterministic eval-mode parameters (f32, PyTorch-equivalent layout)."""
    ks = jax.random.split(key, 16)
    u = lambda k, shp, s=0.1: jax.random.uniform(k, shp, jnp.float32, -s, s)

    # conv1: Conv1d(input_size, 512, k=1, bias=False); used as rows @ Wc with
    # Wc = weight[:, :, 0].T -> (cin, 512)
    wc = u(ks[0], (input_size, OF1))
    bn1 = (1.0 + u(ks[1], (OF1,)), u(ks[2], (OF1,)),
           u(ks[3], (OF1,)), 0.5 + jnp.abs(u(ks[4], (OF1,))))
    w1 = u(ks[5], (OF1, H1))                           # mlp1 (bias=False)
    bn2 = (1.0 + u(ks[6], (H1,)), u(ks[7], (H1,)),
           u(ks[8], (H1,)), 0.5 + jnp.abs(u(ks[9], (H1,))))
    w2 = u(ks[10], (H1, H2))                           # mlp2 (bias=True)
    b2 = u(ks[11], (H2,))
    bn3 = (1.0 + u(ks[12], (H2,)), u(ks[13], (H2,)),
           jnp.zeros((H2,)), jnp.ones((H2,)))
    w3 = u(ks[14], (H2, NUM_CLASS))                    # mlp3
    b3 = u(ks[15], (NUM_CLASS,))
    # fc2: frozen weight[0, i] = pergroup * i
    wfc2 = (PERGROUP * jnp.arange(NUM_CLASS, dtype=jnp.float32))[None, :]
    return dict(wc=wc, bn1=bn1, w1=w1, bn2=bn2, w2=w2, b2=b2, bn3=bn3,
                w3=w3, b3=b3, wfc2=wfc2)


def prepare_kernel_params(raw):
    """Fold eval-mode BN scales into the preceding weights, cast matmul
    operands to bf16 (f32 accumulation stays in-kernel), and pad the class
    dimension to a full 128-lane group."""
    s1, t1 = _fold_bn(*raw["bn1"])
    s2, t2 = _fold_bn(*raw["bn2"])
    s3, t3 = _fold_bn(*raw["bn3"])

    wc = (raw["wc"] * s1[None, :]).astype(jnp.bfloat16)
    w1 = (raw["w1"] * s2[None, :]).astype(jnp.bfloat16)
    w2 = (raw["w2"] * s3[None, :]).astype(jnp.bfloat16)
    b2 = (raw["b2"] * s3 + t3)[None, :].astype(jnp.float32)

    w3 = jnp.zeros((H2, NC_PAD), jnp.float32).at[:, :NUM_CLASS].set(raw["w3"])
    w3 = w3.astype(jnp.bfloat16)
    b3 = jnp.full((1, NC_PAD), NEG_BIG, jnp.float32).at[0, :NUM_CLASS].set(raw["b3"])

    return (wc, t1[None, :].astype(jnp.float32),
            w1, t2[None, :].astype(jnp.float32),
            w2, b2, w3, b3)


def _reference(x_bcn, raw):
    """Pure-JAX f32 reference of the same eval-mode forward pass."""
    B, cin, N = x_bcn.shape
    x = jnp.transpose(x_bcn, (0, 2, 1)).reshape(B * N, cin)
    s1, t1 = _fold_bn(*raw["bn1"])
    s2, t2 = _fold_bn(*raw["bn2"])
    s3, t3 = _fold_bn(*raw["bn3"])
    h = jnp.maximum(x @ raw["wc"] * s1 + t1, 0.0)
    h = jnp.maximum(h @ raw["w1"] * s2 + t2, 0.0)
    h = jnp.maximum((h @ raw["w2"] + raw["b2"]) * s3 + t3, 0.0)
    logits = h @ raw["w3"] + raw["b3"]
    p = jax.nn.softmax(logits, axis=1)
    d = jnp.sum(p * raw["wfc2"], axis=1)
    return p, d


if __name__ == "__main__":
    key = jax.random.PRNGKey(0)
    k_x, k_p = jax.random.split(key)

    B, INPUT_SIZE, N = 2, 4, 16   # small shapes; x is (B, input_size, N)
    x = jax.random.normal(k_x, (B, INPUT_SIZE, N), dtype=jnp.float32)
    raw = make_raw_params(k_p, INPUT_SIZE)
    kparams = prepare_kernel_params(raw)

    p_vec, density = density_prediction_forward(x, kparams, raw["wfc2"])
    jax.block_until_ready((p_vec, density))

    p_ref, d_ref = _reference(x, raw)
    assert p_vec.shape == (B * N, NUM_CLASS) and density.shape == (B * N,)
    # bf16 matmul operands + approx softmax reciprocal -> loosened tolerances
    assert jnp.allclose(p_vec, p_ref, atol=2e-2, rtol=2e-2)
    assert jnp.allclose(density, d_ref, atol=2e-2, rtol=2e-2)

    print("KERNEL_OK")
</pallas_src>

<mosaic_0001>
module attributes {stable_mosaic.version = 11 : i64} {
  func.func @_density_kernel(%arg0: i32, %arg1: memref<128x4xbf16, #tpu.memory_space<vmem>>, %arg2: memref<4x512xbf16, #tpu.memory_space<vmem>>, %arg3: memref<1x512xf32, #tpu.memory_space<vmem>>, %arg4: memref<512x256xbf16, #tpu.memory_space<vmem>>, %arg5: memref<1x256xf32, #tpu.memory_space<vmem>>, %arg6: memref<256x256xbf16, #tpu.memory_space<vmem>>, %arg7: memref<1x256xf32, #tpu.memory_space<vmem>>, %arg8: memref<256x128xbf16, #tpu.memory_space<vmem>>, %arg9: memref<1x128xf32, #tpu.memory_space<vmem>>, %arg10: memref<128x128xf32, #tpu.memory_space<vmem>>) attributes {dimension_semantics = [#tpu.dimension_semantics<parallel>], iteration_bounds = array<i64: 1>, scalar_prefetch = 0 : i64, scratch_operands = 0 : i64, tpu.core_type = #tpu.core_type<tc>, window_params = [{transform_indices = @transform_0, window_bounds = array<i64: 128, 4>}, {pipeline_mode = #tpu.pipeline_mode<synchronous>, transform_indices = @transform_1, window_bounds = array<i64: 4, 512>}, {pipeline_mode = #tpu.pipeline_mode<synchronous>, transform_indices = @transform_2, window_bounds = array<i64: 1, 512>}, {pipeline_mode = #tpu.pipeline_mode<synchronous>, transform_indices = @transform_3, window_bounds = array<i64: 512, 256>}, {pipeline_mode = #tpu.pipeline_mode<synchronous>, transform_indices = @transform_4, window_bounds = array<i64: 1, 256>}, {pipeline_mode = #tpu.pipeline_mode<synchronous>, transform_indices = @transform_5, window_bounds = array<i64: 256, 256>}, {pipeline_mode = #tpu.pipeline_mode<synchronous>, transform_indices = @transform_6, window_bounds = array<i64: 1, 256>}, {pipeline_mode = #tpu.pipeline_mode<synchronous>, transform_indices = @transform_7, window_bounds = array<i64: 256, 128>}, {pipeline_mode = #tpu.pipeline_mode<synchronous>, transform_indices = @transform_8, window_bounds = array<i64: 1, 128>}, {transform_indices = @transform_9, window_bounds = array<i64: 128, 128>}]} {
    %c0 = arith.constant 0 : index
    %c0_0 = arith.constant 0 : index
    %0 = vector.load %arg1[%c0, %c0_0] : memref<128x4xbf16, #tpu.memory_space<vmem>>, vector<128x4xbf16>
    %c0_1 = arith.constant 0 : index
    %c0_2 = arith.constant 0 : index
    %1 = vector.load %arg2[%c0_1, %c0_2] : memref<4x512xbf16, #tpu.memory_space<vmem>>, vector<4x512xbf16>
    %cst = arith.constant dense<0.000000e+00> : vector<128x512xf32>
    %2 = tpu.matmul %0, %1, %cst {dimension_numbers = #tpu.dot_dimension_numbers<[1], [0], [0], [1], [0, 0, 1, 1], [], []>} : vector<128x4xbf16>, vector<4x512xbf16>, vector<128x512xf32> -> vector<128x512xf32>
    %c0_3 = arith.constant 0 : index
    %c0_4 = arith.constant 0 : index
    %3 = vector.load %arg3[%c0_3, %c0_4] : memref<1x512xf32, #tpu.memory_space<vmem>>, vector<1x512xf32>
    %4 = vector.broadcast %3 : vector<1x512xf32> to vector<128x512xf32>
    %5 = arith.addf %2, %4 : vector<128x512xf32>
    %cst_5 = arith.constant 0.000000e+00 : f32
    %6 = vector.broadcast %cst_5 : f32 to vector<128x512xf32>
    %7 = arith.maximumf %5, %6 : vector<128x512xf32>
    %8 = arith.truncf %7 : vector<128x512xf32> to vector<128x512xbf16>
    %c0_6 = arith.constant 0 : index
    %c0_7 = arith.constant 0 : index
    %9 = vector.load %arg4[%c0_6, %c0_7] : memref<512x256xbf16, #tpu.memory_space<vmem>>, vector<512x256xbf16>
    %cst_8 = arith.constant dense<0.000000e+00> : vector<128x256xf32>
    %10 = tpu.matmul %8, %9, %cst_8 {dimension_numbers = #tpu.dot_dimension_numbers<[1], [0], [0], [1], [0, 0, 1, 1], [], []>} : vector<128x512xbf16>, vector<512x256xbf16>, vector<128x256xf32> -> vector<128x256xf32>
    %c0_9 = arith.constant 0 : index
    %c0_10 = arith.constant 0 : index
    %11 = vector.load %arg5[%c0_9, %c0_10] : memref<1x256xf32, #tpu.memory_space<vmem>>, vector<1x256xf32>
    %12 = vector.broadcast %11 : vector<1x256xf32> to vector<128x256xf32>
    %13 = arith.addf %10, %12 : vector<128x256xf32>
    %cst_11 = arith.constant 0.000000e+00 : f32
    %14 = vector.broadcast %cst_11 : f32 to vector<128x256xf32>
    %15 = arith.maximumf %13, %14 : vector<128x256xf32>
    %16 = arith.truncf %15 : vector<128x256xf32> to vector<128x256xbf16>
    %c0_12 = arith.constant 0 : index
    %c0_13 = arith.constant 0 : index
    %17 = vector.load %arg6[%c0_12, %c0_13] : memref<256x256xbf16, #tpu.memory_space<vmem>>, vector<256x256xbf16>
    %cst_14 = arith.constant dense<0.000000e+00> : vector<128x256xf32>
    %18 = tpu.matmul %16, %17, %cst_14 {dimension_numbers = #tpu.dot_dimension_numbers<[1], [0], [0], [1], [0, 0, 1, 1], [], []>} : vector<128x256xbf16>, vector<256x256xbf16>, vector<128x256xf32> -> vector<128x256xf32>
    %c0_15 = arith.constant 0 : index
    %c0_16 = arith.constant 0 : index
    %19 = vector.load %arg7[%c0_15, %c0_16] : memref<1x256xf32, #tpu.memory_space<vmem>>, vector<1x256xf32>
    %20 = vector.broadcast %19 : vector<1x256xf32> to vector<128x256xf32>
    %21 = arith.addf %18, %20 : vector<128x256xf32>
    %cst_17 = arith.constant 0.000000e+00 : f32
    %22 = vector.broadcast %cst_17 : f32 to vector<128x256xf32>
    %23 = arith.maximumf %21, %22 : vector<128x256xf32>
    %24 = arith.truncf %23 : vector<128x256xf32> to vector<128x256xbf16>
    %c0_18 = arith.constant 0 : index
    %c0_19 = arith.constant 0 : index
    %25 = vector.load %arg8[%c0_18, %c0_19] : memref<256x128xbf16, #tpu.memory_space<vmem>>, vector<256x128xbf16>
    %cst_20 = arith.constant dense<0.000000e+00> : vector<128x128xf32>
    %26 = tpu.matmul %24, %25, %cst_20 {dimension_numbers = #tpu.dot_dimension_numbers<[1], [0], [0], [1], [0, 0, 1, 1], [], []>} : vector<128x256xbf16>, vector<256x128xbf16>, vector<128x128xf32> -> vector<128x128xf32>
    %c0_21 = arith.constant 0 : index
    %c0_22 = arith.constant 0 : index
    %27 = vector.load %arg9[%c0_21, %c0_22] : memref<1x128xf32, #tpu.memory_space<vmem>>, vector<1x128xf32>
    %28 = vector.broadcast %27 : vector<1x128xf32> to vector<128x128xf32>
    %29 = arith.addf %26, %28 : vector<128x128xf32>
    %cst_23 = arith.constant dense<0xFF800000> : vector<128xf32>
    %30 = vector.multi_reduction <maximumf>, %29, %cst_23 [1] : vector<128x128xf32> to vector<128xf32>
    %31 = vector.shape_cast %30 : vector<128xf32> to vector<128x1xf32>
    %32 = vector.broadcast %31 : vector<128x1xf32> to vector<128x128xf32>
    %33 = arith.subf %29, %32 : vector<128x128xf32>
    %34 = math.exp %33 : vector<128x128xf32>
    %cst_24 = arith.constant dense<0.000000e+00> : vector<128xf32>
    %35 = vector.multi_reduction <add>, %34, %cst_24 [1] : vector<128x128xf32> to vector<128xf32>
    %36 = vector.shape_cast %35 : vector<128xf32> to vector<128x1xf32>
    %37 = tpu.reciprocal %36 {approx = true} : vector<128x1xf32> -> vector<128x1xf32>
    %38 = vector.broadcast %37 : vector<128x1xf32> to vector<128x128xf32>
    %39 = arith.mulf %34, %38 : vector<128x128xf32>
    %c0_25 = arith.constant 0 : index
    %c0_26 = arith.constant 0 : index
    %40 = vector.load %arg10[%c0_25, %c0_26] : memref<128x128xf32, #tpu.memory_space<vmem>>, vector<128x128xf32>
    tpu.vector_store %arg10[%c0_25, %c0_26], %39 {strides = array<i32>} : memref<128x128xf32, #tpu.memory_space<vmem>>, vector<128x128xf32>,
    return
  }
  func.func @transform_0(%arg0: i32) -> (i32, i32) {
    %c0_i32 = arith.constant 0 : i32
    %c0_i32_0 = arith.constant 0 : i32
    return %arg0, %c0_i32 : i32, i32
  }
  func.func @transform_1(%arg0: i32) -> (i32, i32) {
    %c0_i32 = arith.constant 0 : i32
    %c0_i32_0 = arith.constant 0 : i32
    %c0_i32_1 = arith.constant 0 : i32
    return %c0_i32, %c0_i32_0 : i32, i32
  }
  func.func @transform_2(%arg0: i32) -> (i32, i32) {
    %c0_i32 = arith.constant 0 : i32
    %c0_i32_0 = arith.constant 0 : i32
    %c0_i32_1 = arith.constant 0 : i32
    return %c0_i32, %c0_i32_0 : i32, i32
  }
  func.func @transform_3(%arg0: i32) -> (i32, i32) {
    %c0_i32 = arith.constant 0 : i32
    %c0_i32_0 = arith.constant 0 : i32
    %c0_i32_1 = arith.constant 0 : i32
    return %c0_i32, %c0_i32_0 : i32, i32
  }
  func.func @transform_4(%arg0: i32) -> (i32, i32) {
    %c0_i32 = arith.constant 0 : i32
    %c0_i32_0 = arith.constant 0 : i32
    %c0_i32_1 = arith.constant 0 : i32
    return %c0_i32, %c0_i32_0 : i32, i32
  }
  func.func @transform_5(%arg0: i32) -> (i32, i32) {
    %c0_i32 = arith.constant 0 : i32
    %c0_i32_0 = arith.constant 0 : i32
    %c0_i32_1 = arith.constant 0 : i32
    return %c0_i32, %c0_i32_0 : i32, i32
  }
  func.func @transform_6(%arg0: i32) -> (i32, i32) {
    %c0_i32 = arith.constant 0 : i32
    %c0_i32_0 = arith.constant 0 : i32
    %c0_i32_1 = arith.constant 0 : i32
    return %c0_i32, %c0_i32_0 : i32, i32
  }
  func.func @transform_7(%arg0: i32) -> (i32, i32) {
    %c0_i32 = arith.constant 0 : i32
    %c0_i32_0 = arith.constant 0 : i32
    %c0_i32_1 = arith.constant 0 : i32
    return %c0_i32, %c0_i32_0 : i32, i32
  }
  func.func @transform_8(%arg0: i32) -> (i32, i32) {
    %c0_i32 = arith.constant 0 : i32
    %c0_i32_0 = arith.constant 0 : i32
    %c0_i32_1 = arith.constant 0 : i32
    return %c0_i32, %c0_i32_0 : i32, i32
  }
  func.func @transform_9(%arg0: i32) -> (i32, i32) {
    %c0_i32 = arith.constant 0 : i32
    %c0_i32_0 = arith.constant 0 : i32
    return %arg0, %c0_i32 : i32, i32
  }
}

</mosaic_0001>

<bundles_post_ra>
// kernel: density_prediction_forward.1
= control target key start
LH: loop header
LB: loop body
LE: loop exit
PB: predicated region body
PF: predicated region fallthrough
CT: control target
= control target key end

     0   :  { %14 = vsyncpa [#allocation3], 0  ;;  %s3101_s0 = inlined_call_operand.vmem [shape: bf16[128,4], index: 0, kind: input, shape index: {}]   ;;  %s3102_s1 = inlined_call_operand.vmem [shape: bf16[4,512], index: 1, kind: input, shape index: {}]   ;;  %s3103_s2 = inlined_call_operand.vmem [shape: f32[1,512], index: 2, kind: input, shape index: {}]   ;;  %s3104_s3 = inlined_call_operand.hbm [shape: bf16[512,256], index: 3, kind: input, shape index: {}]   ;;  %s3105_s4 = inlined_call_operand.vmem [shape: f32[1,256], index: 4, kind: input, shape index: {}]   ;;  %s3106_s5 = inlined_call_operand.hbm [shape: bf16[256,256], index: 5, kind: input, shape index: {}]   ;;  %s3107_s6 = inlined_call_operand.vmem [shape: f32[1,256], index: 6, kind: input, shape index: {}]   ;;  %s3108_s7 = inlined_call_operand.vmem [shape: bf16[256,128], index: 7, kind: input, shape index: {}]   ;;  %s3109_s8 = inlined_call_operand.vmem [shape: f32[1,128], index: 8, kind: input, shape index: {}]   ;;  %s3110_s9 = inlined_call_operand.vmem [shape: f32[128,128], index: 9, kind: output, shape index: {}]  }
   0x1   :  { %15 = vsyncpa [#allocation5], 0  ;;  %s2505_s30 = smov [#allocation2]   ;;  %s2457_s13 = scalar_lea.hbm %s3104_s3, 8192 }
   0x2   :  { %s27_s10 = sshll.u32 %s2505_s30, 4  ;;  %p2458_p0 = scmp.ne.s32.totalorder %s3104_s3, %s2457_s13  ;;  %s28_s10 = int_to_ptr.vmem [resolvable:$true] %s27_s10 }
   0x3   :  { %p2461_p1 = scmp.lt.u32.totalorder %s2457_s13, %s3104_s3 }
   0x5   :  { %p2463_p2 = pnand %p2461_p1, %p2458_p0 }
   0x7   :  { %2466 = shalt.err (!%p2463_p2)
}
   0x8   :  { %s2467_s18 = scalar_lea.vmem %s28_s10, 8192  ;;  %p2472_p4 = scmp.lt.s32.totalorder %s28_s10, %s28_s10 }
   0x9   :  { %p2468_p3 = scmp.ne.s32.totalorder %s28_s10, %s2467_s18  ;;  %p2473_p5 = scmp.lt.s32.totalorder %s2467_s18, %s2467_s18 }
   0xb   :  { %p2474_p6 = por %p2473_p5, %p2472_p4 }
   0xd   :  { %p2475_p7 = pnand %p2474_p6, %p2468_p3 }
   0xf   :  { %2478 = shalt.err (!%p2475_p7)
}
  0x10   :  { %s2506_s19 = smov 128   ;;  %s2507_s20 = smov 8  }
  0x11   :  { %33 = dma.hbm_to_vmem [thread:$0]  %s3104_s3, 8192, %s28_s10, [#allocation3], %s2506_s19, %s2506_s19, %s2507_s20  }
  0x12   :  { %s2508_s23 = smov [#allocation4]   ;;  %s2479_s27 = scalar_lea.hbm %s3106_s5, 4096 }
  0x13   :  { %s41_s24 = sshll.u32 %s2508_s23, 4  ;;  %p2480_p8 = scmp.ne.s32.totalorder %s3106_s5, %s2479_s27  ;;  %s42_s24 = int_to_ptr.vmem [resolvable:$true] %s41_s24 }
  0x14   :  { %p2483_p9 = scmp.lt.u32.totalorder %s2479_s27, %s3106_s5 }
  0x16   :  { %p2485_p10 = pnand %p2483_p9, %p2480_p8 }
  0x18   :  { %2488 = shalt.err (!%p2485_p10)
}
  0x19   :  { %s2489_s12 = scalar_lea.vmem %s42_s24, 4096  ;;  %p2494_p12 = scmp.lt.s32.totalorder %s42_s24, %s42_s24 }
  0x1a   :  { %p2490_p11 = scmp.ne.s32.totalorder %s42_s24, %s2489_s12  ;;  %p2495_p13 = scmp.lt.s32.totalorder %s2489_s12, %s2489_s12 }
  0x1c   :  { %p2496_p0 = por %p2495_p13, %p2494_p12 }
  0x1e   :  { %p2497_p1 = pnand %p2496_p0, %p2490_p11 }
  0x20   :  { %2500 = shalt.err (!%p2497_p1)
}
  0x21   :  { %47 = dma.hbm_to_vmem [thread:$0]  %s3106_s5, 4096, %s42_s24, [#allocation5], %s2506_s19, %s2506_s19, %s2507_s20  }
  0x22   :  { %2501 = dma.done.wait [#allocation3], 8192  }
  0x23   :  { %2502 = vsyncadd [#allocation3], 4294959104 }
  0x24   :  { %2503 = dma.done.wait [#allocation5], 4096  }
  0x25   :  { %2504 = vsyncadd [#allocation5], 4294963200  ;;  %v80_v0 = vlaneseq  ;;  %v2509_v1 = vmov 1983009808   ;;  %v2510_v3 = vmov 0   ;;  %v77_v8 = vld [vmem:[%s3102_s1] sm:$0xff] }
  0x26   :  { %v143_v2 = vunpack.c.l.s4 %v2509_v1  ;;  %228 = vmatprep.mubr.bf16.mxu0 %v2510_v3  ;;  %341 = vmatprep.mubr.bf16.mxu1 %v2510_v3  ;;  %v2597_v9 = vld [vmem:[%s3103_s2] sm:$0xf]  ;;  %vm183_vm0 = vcmask 1041408   ;;  %v141_v12 = vcombine.high %v77_v8, %v77_v8  ;;  %vm158_vm1 = vcmask 31744   ;;  %v2235_v20 = vld [vmem:[#allocation2 + $0x4] ss:$8 sps:$4 sm:$0xff]  }
  0x27   :  { %v2587_v4 = vshrl.u32 %v80_v0, 7  ;;  %v2224_v16 = vld [vmem:[%s3101_s0] sm:$0xff]   ;;  %v2238_v21 = vld [vmem:[#allocation2 + $0x14] ss:$8 sps:$4 sm:$0xff]   ;;  %v2236_v22 = vld [vmem:[#allocation2 + $0x10] ss:$8 sps:$4 sm:$0xff]  }
  0x28   :  { %v144_v5 = vunpack.c.0.s8 %v143_v2  ;;  %v2233_v19 = vld [vmem:[#allocation2] ss:$8 sps:$4 sm:$0xff]   ;;  %v2241_v24 = vld [vmem:[#allocation2 + $0x24] ss:$8 sps:$4 sm:$0xff]   ;;  %v2244_v26 = vld [vmem:[#allocation2 + $0x34] ss:$8 sps:$4 sm:$0xff]  }
  0x29   :  { %v90_v6 = vsub.s32 2, %v2587_v4  ;;  %v2225_v23 = vld [vmem:[%s3101_s0 + $0x8] sm:$0xff]   ;;  %v2242_v27 = vld [vmem:[#allocation2 + $0x30] ss:$8 sps:$4 sm:$0xff]   ;;  %v2250_v31 = vld [vmem:[#allocation2 + $0x54] ss:$8 sps:$4 sm:$0xff]  }
  0x2a   :  { %v147_v7 = vsub.s32 %v144_v5, %v2587_v4  ;;  %v2239_v25 = vld [vmem:[#allocation2 + $0x20] ss:$8 sps:$4 sm:$0xff]   ;;  %v2226_v28 = vld [vmem:[%s3101_s0 + $0x10] sm:$0xff]   ;;  %v2247_v29 = vld [vmem:[#allocation2 + $0x44] ss:$8 sps:$4 sm:$0xff]   ;;  %v2657_v59 = vsub.s32 0, %v2587_v4 }
  0x2b   :  { %v2600_v10 = vrot.slane %v2597_v9, %v90_v6  ;;  %v2245_v30 = vld [vmem:[#allocation2 + $0x40] ss:$8 sps:$4 sm:$0xff]   ;;  %v2248_v32 = vld [vmem:[#allocation2 + $0x50] ss:$8 sps:$4 sm:$0xff]   ;;  %v2253_v34 = vld [vmem:[#allocation2 + $0x64] ss:$8 sps:$4 sm:$0xff]  }
  0x2c   :  { %v148_v11 = vrot.slane %v77_v8, %v147_v7  ;;  %v155_v15 = vrot.slane %v141_v12, %v147_v7  ;;  %v2227_v33 = vld [vmem:[%s3101_s0 + $0x18] sm:$0xff]   ;;  %v2251_v35 = vld [vmem:[#allocation2 + $0x60] ss:$8 sps:$4 sm:$0xff]   ;;  %v2259_v39 = vld [vmem:[#allocation2 + $0x84] ss:$8 sps:$4 sm:$0xff]   ;;  %v2660_v60 = vsub.s32 1, %v2587_v4  ;;  %v2664_v61 = vrot.slane %v2597_v9, %v2657_v59 }
  0x2d   :  { %v2256_v36 = vld [vmem:[#allocation2 + $0x74] ss:$8 sps:$4 sm:$0xff]   ;;  %v2254_v37 = vld [vmem:[#allocation2 + $0x70] ss:$8 sps:$4 sm:$0xff]   ;;  %v2228_v38 = vld [vmem:[%s3101_s0 + $0x20] sm:$0xff]   ;;  %v94_v62 = vsub.s32 3, %v2587_v4 }
  0x2e   :  { %v156_v13 = vcombine.high %v148_v11, %v148_v11  ;;  %v185_v14 = vsel %vm183_vm0, %v148_v11, 0  ;;  %v157_v17 = vcombine.high %v155_v15, %v155_v15  ;;  %v191_v18 = vsel %vm183_vm0, %v155_v15, 0  ;;  %v2257_v40 = vld [vmem:[#allocation2 + $0x80] ss:$8 sps:$4 sm:$0xff]   ;;  %v2262_v41 = vld [vmem:[#allocation2 + $0x94] ss:$8 sps:$4 sm:$0xff]  }
  0x2f   :  { %v2260_v42 = vld [vmem:[#allocation2 + $0x90] ss:$8 sps:$4 sm:$0xff]   ;;  %v2229_v43 = vld [vmem:[%s3101_s0 + $0x28] sm:$0xff]   ;;  %v2268_v46 = vld [vmem:[#allocation2 + $0xb4] ss:$8 sps:$4 sm:$0xff]   ;;  %v2669_v63 = vrot.slane %v2597_v9, %v2660_v60  ;;  %v2672_v1 = vrot.slane %v2597_v9, %v94_v62 }
  0x30   :  { %1959 = vmatprep.subr.msk.bf16.mxu0 %vm183_vm0, %v156_v13  ;;  %1968 = vmatprep.subr.msk.bf16.mxu1 %vm183_vm0, %v157_v17  ;;  %v2265_v44 = vld [vmem:[#allocation2 + $0xa4] ss:$8 sps:$4 sm:$0xff]   ;;  %v2263_v45 = vld [vmem:[#allocation2 + $0xa0] ss:$8 sps:$4 sm:$0xff]   ;;  %v2266_v47 = vld [vmem:[#allocation2 + $0xb0] ss:$8 sps:$4 sm:$0xff]  }
  0x31   :  { %197 = vmatpush1.bf16.msra.mxu0 %v185_v14  ;;  %310 = vmatpush1.bf16.msra.mxu1 %v191_v18  ;;  %v2230_v48 = vld [vmem:[%s3101_s0 + $0x30] sm:$0xff]   ;;  %v2271_v49 = vld [vmem:[#allocation2 + $0xc4] ss:$8 sps:$4 sm:$0xff]   ;;  %v2269_v50 = vld [vmem:[#allocation2 + $0xc0] ss:$8 sps:$4 sm:$0xff]  }
  0x32   :  { %914 = vmatprep.subr.bf16.mxu0 %v2235_v20  ;;  %v2274_v51 = vld [vmem:[#allocation2 + $0xd4] ss:$8 sps:$4 sm:$0xff]   ;;  %v2272_v52 = vld [vmem:[#allocation2 + $0xd0] ss:$8 sps:$4 sm:$0xff]   ;;  %v2277_v54 = vld [vmem:[#allocation2 + $0xe4] ss:$8 sps:$4 sm:$0xff]  }
  0x33   :  { %v2231_v53 = vld [vmem:[%s3101_s0 + $0x38] sm:$0xff]   ;;  %v2275_v55 = vld [vmem:[#allocation2 + $0xe0] ss:$8 sps:$4 sm:$0xff]   ;;  %v2283_v58 = vld [vmem:[#allocation2 + $0x104] ss:$8 sps:$4 sm:$0xff]  }
  0x34   :  { %1960 = vmatmul.mubr.msk.bf16.vlgmr.msra.gmra.mrb[0].mxu0 %vm158_vm1, %v2224_v16  ;;  %1969 = vmatmul.mubr.msk.bf16.vlgmr.msra.gmra.mrb[0].mxu1 %vm158_vm1, %v2224_v16  ;;  %v2280_v56 = vld [vmem:[#allocation2 + $0xf4] ss:$8 sps:$4 sm:$0xff]   ;;  %v2278_v57 = vld [vmem:[#allocation2 + $0xf0] ss:$8 sps:$4 sm:$0xff]   ;;  %v2329_v12 = vld [vmem:[#allocation4] ss:$8 sps:$4 sm:$0xff]  }
  0x35   :  { %238 = vmatprep.mubr.bf16.mxu0 %v2510_v3  ;;  %915 = vmatpush1.bf16.msra.mxu0 %v2233_v19  ;;  %v2331_v15 = vld [vmem:[#allocation4 + $0x4] ss:$8 sps:$4 sm:$0xff]   ;;  %v2334_v19 = vld [vmem:[#allocation4 + $0x14] ss:$8 sps:$4 sm:$0xff]  }
  0x36   :  { %351 = vmatprep.mubr.bf16.mxu1 %v2510_v3  ;;  %916 = vmatprep.subr.bf16.mxu0 %v2238_v21 }
  0x37   :  { %1392 = vmatprep.subr.bf16.mxu1 %v2331_v15  ;;  %v2292_v15 = vld [vmem:[#allocation2 + $0x134] ss:$8 sps:$4 sm:$0xff]  }
  0x38   :  { %1393 = vmatpush1.bf16.msra.mxu1 %v2329_v12 }
  0x39   :  { %917 = vmatpush1.bf16.msra.mxu0 %v2236_v22  ;;  %1394 = vmatprep.subr.bf16.mxu1 %v2334_v19 }
  0x3a   :  { %918 = vmatprep.subr.bf16.mxu0 %v2241_v24 }
  0x3c   :  { %1961 = vmatmul.mubr.msk.bf16.gmra.mrb[4].mxu0 %vm158_vm1, %v2225_v23  ;;  %1970 = vmatmul.mubr.msk.bf16.gmra.mrb[4].mxu1 %vm158_vm1, %v2225_v23 }
  0x3d   :  { %248 = vmatprep.mubr.bf16.mxu0 %v2510_v3  ;;  %919 = vmatpush1.bf16.msra.mxu0 %v2239_v25 }
  0x3e   :  { %361 = vmatprep.mubr.bf16.mxu1 %v2510_v3  ;;  %920 = vmatprep.subr.bf16.mxu0 %v2244_v26 }
  0x41   :  { %921 = vmatpush1.bf16.msra.mxu0 %v2242_v27 }
  0x42   :  { %922 = vmatprep.subr.bf16.mxu0 %v2247_v29 }
  0x44   :  { %1962 = vmatmul.mubr.msk.bf16.gmra.mrb[8].mxu0 %vm158_vm1, %v2226_v28  ;;  %1971 = vmatmul.mubr.msk.bf16.gmra.mrb[8].mxu1 %vm158_vm1, %v2226_v28  ;;  %v2332_v28 = vld [vmem:[#allocation4 + $0x10] ss:$8 sps:$4 sm:$0xff]  }
  0x45   :  { %258 = vmatprep.mubr.bf16.mxu0 %v2510_v3  ;;  %923 = vmatpush1.bf16.msra.mxu0 %v2245_v30 }
  0x46   :  { %371 = vmatprep.mubr.bf16.mxu1 %v2510_v3  ;;  %924 = vmatprep.subr.bf16.mxu0 %v2250_v31  ;;  %v2281_v31 = vld [vmem:[#allocation2 + $0x100] ss:$8 sps:$4 sm:$0xff]  }
  0x47   :  { %1395 = vmatpush1.bf16.msra.mxu1 %v2332_v28  ;;  %v2346_v28 = vld [vmem:[#allocation4 + $0x54] ss:$8 sps:$4 sm:$0xff]  }
  0x49   :  { %925 = vmatpush1.bf16.msra.mxu0 %v2248_v32 }
  0x4a   :  { %926 = vmatprep.subr.bf16.mxu0 %v2253_v34 }
  0x4c   :  { %1963 = vmatmul.mubr.msk.bf16.gmra.mrb[12].mxu0 %vm158_vm1, %v2227_v33  ;;  %1972 = vmatmul.mubr.msk.bf16.gmra.mrb[12].mxu1 %vm158_vm1, %v2227_v33  ;;  %v2337_v33 = vld [vmem:[#allocation4 + $0x24] ss:$8 sps:$4 sm:$0xff]  }
  0x4d   :  { %268 = vmatprep.mubr.bf16.mxu0 %v2510_v3  ;;  %927 = vmatpush1.bf16.msra.mxu0 %v2251_v35 }
  0x4e   :  { %381 = vmatprep.mubr.bf16.mxu1 %v2510_v3  ;;  %928 = vmatprep.subr.bf16.mxu0 %v2256_v36  ;;  %v2286_v36 = vld [vmem:[#allocation2 + $0x114] ss:$8 sps:$4 sm:$0xff]  }
  0x4f   :  { %1396 = vmatprep.subr.bf16.mxu1 %v2337_v33 }
  0x51   :  { %929 = vmatpush1.bf16.msra.mxu0 %v2254_v37 }
  0x52   :  { %930 = vmatprep.subr.bf16.mxu0 %v2259_v39 }
  0x54   :  { %1964 = vmatmul.mubr.msk.bf16.gmra.mrb[16].mxu0 %vm158_vm1, %v2228_v38  ;;  %1973 = vmatmul.mubr.msk.bf16.gmra.mrb[16].mxu1 %vm158_vm1, %v2228_v38 }
  0x55   :  { %278 = vmatprep.mubr.bf16.mxu0 %v2510_v3  ;;  %931 = vmatpush1.bf16.msra.mxu0 %v2257_v40 }
  0x56   :  { %391 = vmatprep.mubr.bf16.mxu1 %v2510_v3  ;;  %932 = vmatprep.subr.bf16.mxu0 %v2262_v41 }
  0x59   :  { %933 = vmatpush1.bf16.msra.mxu0 %v2260_v42 }
  0x5a   :  { %934 = vmatprep.subr.bf16.mxu0 %v2265_v44 }
  0x5c   :  { %1965 = vmatmul.mubr.msk.bf16.gmra.mrb[20].mxu0 %vm158_vm1, %v2229_v43  ;;  %1974 = vmatmul.mubr.msk.bf16.gmra.mrb[20].mxu1 %vm158_vm1, %v2229_v43 }
  0x5d   :  { %288 = vmatprep.mubr.bf16.mxu0 %v2510_v3  ;;  %935 = vmatpush1.bf16.msra.mxu0 %v2263_v45  ;;  %v2335_v45 = vld [vmem:[#allocation4 + $0x20] ss:$8 sps:$4 sm:$0xff]  }
  0x5e   :  { %401 = vmatprep.mubr.bf16.mxu1 %v2510_v3  ;;  %936 = vmatprep.subr.bf16.mxu0 %v2268_v46 }
  0x5f   :  { %1397 = vmatpush1.bf16.msra.mxu1 %v2335_v45 }
  0x61   :  { %937 = vmatpush1.bf16.msra.mxu0 %v2266_v47  ;;  %v2284_v47 = vld [vmem:[#allocation2 + $0x110] ss:$8 sps:$4 sm:$0xff]  }
  0x62   :  { %938 = vmatprep.subr.bf16.mxu0 %v2271_v49 }
  0x64   :  { %1966 = vmatmul.mubr.msk.bf16.gmra.mrb[24].mxu0 %vm158_vm1, %v2230_v48  ;;  %1975 = vmatmul.mubr.msk.bf16.gmra.mrb[24].mxu1 %vm158_vm1, %v2230_v48 }
  0x65   :  { %298 = vmatprep.mubr.bf16.mxu0 %v2510_v3  ;;  %939 = vmatpush1.bf16.msra.mxu0 %v2269_v50  ;;  %v2340_v50 = vld [vmem:[#allocation4 + $0x34] ss:$8 sps:$4 sm:$0xff]  }
  0x66   :  { %411 = vmatprep.mubr.bf16.mxu1 %v2510_v3  ;;  %940 = vmatprep.subr.bf16.mxu0 %v2274_v51 }
  0x67   :  { %1398 = vmatprep.subr.bf16.mxu1 %v2340_v50 }
  0x69   :  { %941 = vmatpush1.bf16.msra.mxu0 %v2272_v52 }
  0x6a   :  { %942 = vmatprep.subr.bf16.mxu0 %v2277_v54 }
  0x6c   :  { %1967 = vmatmul.mubr.msk.bf16.gmra.mrb[28].mxu0 %vm158_vm1, %v2231_v53  ;;  %1976 = vmatmul.mubr.msk.bf16.gmra.mrb[28].mxu1 %vm158_vm1, %v2231_v53  ;;  %v2289_v53 = vld [vmem:[#allocation2 + $0x124] ss:$8 sps:$4 sm:$0xff]  }
  0x6d   :  { %943 = vmatpush1.bf16.msra.mxu0 %v2275_v55 }
  0x6e   :  { %944 = vmatprep.subr.bf16.mxu0 %v2280_v56 }
  0x71   :  { %945 = vmatpush1.bf16.msra.mxu0 %v2278_v57 }
  0x72   :  { %1027 = vmatprep.subr.bf16.mxu0 %v2283_v58 }
 0x107   :  { %v230_v0 = vpop.f32.mrb[0].mxu0  ;;  %v343_v11 = vpop.f32.mrb[0].mxu1 }
 0x108   :  { %v231_v2 = vadd.f32 %v230_v0, %v2664_v61  ;;  %v232_v3 = vpop.f32.mrb[1].mxu0  ;;  %v344_v13 = vadd.f32 %v343_v11, %v2600_v10  ;;  %v345_v14 = vpop.f32.mrb[1].mxu1  ;;  %v2287_v11 = vld [vmem:[#allocation2 + $0x120] ss:$8 sps:$4 sm:$0xff]  }
 0x109   :  { %v233_v5 = vadd.f32 %v232_v3, %v2669_v63  ;;  %v234_v6 = vpop.f32.mrb[2].mxu0  ;;  %v346_v17 = vadd.f32 %v345_v14, %v2672_v1  ;;  %v347_v18 = vpop.f32.mrb[2].mxu1 }
 0x10a   :  { %v235_v7 = vadd.f32 %v234_v6, %v2664_v61  ;;  %v236_v8 = vpop.f32.mrb[3].mxu0  ;;  %v422_v16 = vmax.f32 %v231_v2, 0.0  ;;  %v424_v22 = vmax.f32 %v344_v13, 0.0  ;;  %v348_v23 = vadd.f32 %v347_v18, %v2600_v10  ;;  %v349_v24 = vpop.f32.mrb[3].mxu1  ;;  %v2338_v6 = vld [vmem:[#allocation4 + $0x30] ss:$8 sps:$4 sm:$0xff]  }
 0x10b   :  { %v237_v4 = vadd.f32 %v236_v8, %v2669_v63  ;;  %v423_v20 = vmax.f32 %v233_v5, 0.0  ;;  %v425_v26 = vmax.f32 %v346_v17, 0.0  ;;  %v350_v27 = vadd.f32 %v349_v24, %v2672_v1  ;;  %1399 = vmatpush1.bf16.msra.mxu1 %v2338_v6 }
 0x10c   :  { %v426_v9 = vmax.f32 %v235_v7, 0.0  ;;  %v428_v32 = vmax.f32 %v348_v23, 0.0  ;;  %v2341_v23 = vld [vmem:[#allocation4 + $0x40] ss:$8 sps:$4 sm:$0xff]  }
 0x10d   :  { %v427_v21 = vmax.f32 %v237_v4, 0.0  ;;  %v429_v37 = vmax.f32 %v350_v27, 0.0  ;;  %v2343_v4 = vld [vmem:[#allocation4 + $0x44] ss:$8 sps:$4 sm:$0xff]  }
 0x10e   :  { %v486_v25 = vpack.c.bf16 %v426_v9, %v422_v16  ;;  %v2684_v40 = vpack.c.bf16 %v428_v32, %v424_v22  ;;  %1400 = vmatprep.subr.bf16.mxu1 %v2343_v4  ;;  %v2301_v4 = vld [vmem:[#allocation2 + $0x164] ss:$8 sps:$4 sm:$0xff]  }
 0x10f   :  { %v487_v29 = vpack.c.bf16 %v427_v21, %v423_v20  ;;  %v240_v30 = vpop.f32.mrb[4].mxu0  ;;  %v2687_v43 = vpack.c.bf16 %v429_v37, %v425_v26  ;;  %v353_v44 = vpop.f32.mrb[4].mxu1  ;;  %1401 = vmatpush1.bf16.msra.mxu1 %v2341_v23 }
 0x110   :  { %v241_v34 = vadd.f32 %v240_v30, %v2664_v61  ;;  %v242_v35 = vpop.f32.mrb[5].mxu0  ;;  %v354_v48 = vadd.f32 %v353_v44, %v2600_v10  ;;  %v355_v49 = vpop.f32.mrb[5].mxu1  ;;  %v2344_v44 = vld [vmem:[#allocation4 + $0x50] ss:$8 sps:$4 sm:$0xff]   ;;  %1402 = vmatprep.subr.bf16.mxu1 %v2346_v28 }
 0x111   :  { %v243_v38 = vadd.f32 %v242_v35, %v2669_v63  ;;  %v244_v39 = vpop.f32.mrb[6].mxu0  ;;  %946 = vmatprep.mubr.bf16.mxu0 %v487_v29  ;;  %v356_v54 = vadd.f32 %v355_v49, %v2672_v1  ;;  %v357_v55 = vpop.f32.mrb[6].mxu1  ;;  %v2349_v49 = vld [vmem:[#allocation4 + $0x64] ss:$8 sps:$4 sm:$0xff]  }
 0x112   :  { %v245_v41 = vadd.f32 %v244_v39, %v2664_v61  ;;  %v246_v42 = vpop.f32.mrb[7].mxu0  ;;  %947 = vmatmul.mubr.bf16.vlgmr.msra.gmra.mrb[32].mxu0 %v486_v25  ;;  %v430_v51 = vmax.f32 %v241_v34, 0.0  ;;  %v432_v58 = vmax.f32 %v354_v48, 0.0  ;;  %v358_v62 = vadd.f32 %v357_v55, %v2600_v10  ;;  %v359_v0 = vpop.f32.mrb[7].mxu1  ;;  %v2290_v25 = vld [vmem:[#allocation2 + $0x130] ss:$8 sps:$4 sm:$0xff]  }
 0x113   :  { %v247_v46 = vadd.f32 %v246_v42, %v2669_v63  ;;  %1028 = vmatpush1.bf16.msra.mxu0 %v2281_v31  ;;  %v431_v56 = vmax.f32 %v243_v38, 0.0  ;;  %v433_v3 = vmax.f32 %v356_v54, 0.0  ;;  %v360_v5 = vadd.f32 %v359_v0, %v2672_v1  ;;  %v2295_v31 = vld [vmem:[#allocation2 + $0x144] ss:$8 sps:$4 sm:$0xff]   ;;  %1403 = vmatpush1.bf16.msra.mxu1 %v2344_v44 }
 0x114   :  { %v434_v52 = vmax.f32 %v245_v41, 0.0  ;;  %1029 = vmatprep.subr.bf16.mxu0 %v2286_v36  ;;  %v436_v12 = vmax.f32 %v358_v62, 0.0  ;;  %1404 = vmatprep.subr.bf16.mxu1 %v2349_v49 }
 0x115   :  { %v435_v57 = vmax.f32 %v247_v46, 0.0  ;;  %v437_v16 = vmax.f32 %v360_v5, 0.0  ;;  %v2296_v5 = vld [vmem:[#allocation2 + $0x150] ss:$8 sps:$4 sm:$0xff]  }
 0x116   :  { %v490_v2 = vpack.c.bf16 %v434_v52, %v430_v51  ;;  %v2696_v18 = vpack.c.bf16 %v436_v12, %v432_v58  ;;  %v2298_v52 = vld [vmem:[#allocation2 + $0x154] ss:$8 sps:$4 sm:$0xff]  }
 0x117   :  { %v491_v7 = vpack.c.bf16 %v435_v57, %v431_v56  ;;  %1030 = vmatpush1.bf16.msra.mxu0 %v2284_v47  ;;  %v250_v8 = vpop.f32.mrb[8].mxu0  ;;  %v2699_v21 = vpack.c.bf16 %v437_v16, %v433_v3  ;;  %v363_v22 = vpop.f32.mrb[8].mxu1  ;;  %v2293_v47 = vld [vmem:[#allocation2 + $0x140] ss:$8 sps:$4 sm:$0xff]  }
 0x118   :  { %v251_v13 = vadd.f32 %v250_v8, %v2664_v61  ;;  %v252_v14 = vpop.f32.mrb[9].mxu0  ;;  %1031 = vmatprep.subr.bf16.mxu0 %v2289_v53  ;;  %v364_v26 = vadd.f32 %v363_v22, %v2600_v10  ;;  %v365_v27 = vpop.f32.mrb[9].mxu1  ;;  %v2352_v8 = vld [vmem:[#allocation4 + $0x74] ss:$8 sps:$4 sm:$0xff]  }
 0x119   :  { %v253_v9 = vadd.f32 %v252_v14, %v2669_v63  ;;  %v254_v17 = vpop.f32.mrb[10].mxu0  ;;  %956 = vmatprep.mubr.bf16.mxu0 %v491_v7  ;;  %v366_v32 = vadd.f32 %v365_v27, %v2672_v1  ;;  %v367_v33 = vpop.f32.mrb[10].mxu1  ;;  %v2299_v27 = vld [vmem:[#allocation2 + $0x160] ss:$8 sps:$4 sm:$0xff]  }
 0x11a   :  { %v255_v19 = vadd.f32 %v254_v17, %v2664_v61  ;;  %v256_v20 = vpop.f32.mrb[11].mxu0  ;;  %957 = vmatmul.mubr.bf16.gmra.mrb[36].mxu0 %v490_v2  ;;  %v438_v29 = vmax.f32 %v251_v13, 0.0  ;;  %v440_v36 = vmax.f32 %v364_v26, 0.0  ;;  %v368_v37 = vadd.f32 %v367_v33, %v2600_v10  ;;  %v369_v38 = vpop.f32.mrb[11].mxu1  ;;  %v2347_v2 = vld [vmem:[#allocation4 + $0x60] ss:$8 sps:$4 sm:$0xff]  }
 0x11b   :  { %v257_v24 = vadd.f32 %v256_v20, %v2669_v63  ;;  %1032 = vmatpush1.bf16.msra.mxu0 %v2287_v11  ;;  %v439_v34 = vmax.f32 %v253_v9, 0.0  ;;  %v441_v41 = vmax.f32 %v366_v32, 0.0  ;;  %v370_v42 = vadd.f32 %v369_v38, %v2672_v1  ;;  %1405 = vmatpush1.bf16.msra.mxu1 %v2347_v2  ;;  %v2304_v32 = vld [vmem:[#allocation2 + $0x174] ss:$8 sps:$4 sm:$0xff]  }
 0x11c   :  { %v442_v30 = vmax.f32 %v255_v19, 0.0  ;;  %1033 = vmatprep.subr.bf16.mxu0 %v2292_v15  ;;  %v444_v48 = vmax.f32 %v368_v37, 0.0  ;;  %1406 = vmatprep.subr.bf16.mxu1 %v2352_v8 }
 0x11d   :  { %v443_v35 = vmax.f32 %v257_v24, 0.0  ;;  %v445_v53 = vmax.f32 %v370_v42, 0.0  ;;  %v2350_v24 = vld [vmem:[#allocation4 + $0x70] ss:$8 sps:$4 sm:$0xff]   ;;  %v2353_v42 = vld [vmem:[#allocation4 + $0x80] ss:$8 sps:$4 sm:$0xff]  }
 0x11e   :  { %v494_v39 = vpack.c.bf16 %v442_v30, %v438_v29  ;;  %v2708_v56 = vpack.c.bf16 %v444_v48, %v440_v36  ;;  %v2355_v29 = vld [vmem:[#allocation4 + $0x84] ss:$8 sps:$4 sm:$0xff]   ;;  %v2358_v48 = vld [vmem:[#allocation4 + $0x94] ss:$8 sps:$4 sm:$0xff]  }
 0x11f   :  { %v495_v45 = vpack.c.bf16 %v443_v35, %v439_v34  ;;  %1034 = vmatpush1.bf16.msra.mxu0 %v2290_v25  ;;  %v260_v46 = vpop.f32.mrb[12].mxu0  ;;  %v2711_v62 = vpack.c.bf16 %v445_v53, %v441_v41  ;;  %v373_v0 = vpop.f32.mrb[12].mxu1  ;;  %1407 = vmatpush1.bf16.msra.mxu1 %v2350_v24 }
 0x120   :  { %v261_v50 = vadd.f32 %v260_v46, %v2664_v61  ;;  %v262_v51 = vpop.f32.mrb[13].mxu0  ;;  %1035 = vmatprep.subr.bf16.mxu0 %v2295_v31  ;;  %v374_v6 = vadd.f32 %v373_v0, %v2600_v10  ;;  %v375_v7 = vpop.f32.mrb[13].mxu1  ;;  %1408 = vmatprep.subr.bf16.mxu1 %v2355_v29 }
 0x121   :  { %v263_v54 = vadd.f32 %v262_v51, %v2669_v63  ;;  %v264_v55 = vpop.f32.mrb[14].mxu0  ;;  %966 = vmatprep.mubr.bf16.mxu0 %v495_v45  ;;  %v376_v13 = vadd.f32 %v375_v7, %v2672_v1  ;;  %v377_v14 = vpop.f32.mrb[14].mxu1  ;;  %v2302_v45 = vld [vmem:[#allocation2 + $0x170] ss:$8 sps:$4 sm:$0xff]   ;;  %v2307_v51 = vld [vmem:[#allocation2 + $0x184] ss:$8 sps:$4 sm:$0xff]  }
 0x122   :  { %v265_v57 = vadd.f32 %v264_v55, %v2664_v61  ;;  %v266_v58 = vpop.f32.mrb[15].mxu0  ;;  %967 = vmatmul.mubr.bf16.gmra.mrb[40].mxu0 %v494_v39  ;;  %v446_v11 = vmax.f32 %v261_v50, 0.0  ;;  %v448_v9 = vmax.f32 %v374_v6, 0.0  ;;  %v378_v17 = vadd.f32 %v377_v14, %v2600_v10  ;;  %v379_v19 = vpop.f32.mrb[15].mxu1  ;;  %v2356_v6 = vld [vmem:[#allocation4 + $0x90] ss:$8 sps:$4 sm:$0xff]  }
 0x123   :  { %v267_v3 = vadd.f32 %v266_v58, %v2669_v63  ;;  %1036 = vmatpush1.bf16.msra.mxu0 %v2293_v47  ;;  %v447_v15 = vmax.f32 %v263_v54, 0.0  ;;  %v449_v22 = vmax.f32 %v376_v13, 0.0  ;;  %v380_v23 = vadd.f32 %v379_v19, %v2672_v1  ;;  %1409 = vmatpush1.bf16.msra.mxu1 %v2353_v42 }
 0x124   :  { %v450_v12 = vmax.f32 %v265_v57, 0.0  ;;  %1037 = vmatprep.subr.bf16.mxu0 %v2298_v52  ;;  %v452_v28 = vmax.f32 %v378_v17, 0.0  ;;  %1410 = vmatprep.subr.bf16.mxu1 %v2358_v48  ;;  %v2362_v48 = vld [vmem:[#allocation4 + $0xb0] ss:$8 sps:$4 sm:$0xff]  }
 0x125   :  { %v451_v16 = vmax.f32 %v267_v3, 0.0  ;;  %v453_v33 = vmax.f32 %v380_v23, 0.0 }
 0x126   :  { %v498_v20 = vpack.c.bf16 %v450_v12, %v446_v11  ;;  %v2720_v36 = vpack.c.bf16 %v452_v28, %v448_v9  ;;  %v2305_v11 = vld [vmem:[#allocation2 + $0x180] ss:$8 sps:$4 sm:$0xff]  }
 0x127   :  { %v499_v25 = vpack.c.bf16 %v451_v16, %v447_v15  ;;  %1038 = vmatpush1.bf16.msra.mxu0 %v2296_v5  ;;  %v270_v26 = vpop.f32.mrb[16].mxu0  ;;  %v2723_v39 = vpack.c.bf16 %v453_v33, %v449_v22  ;;  %v383_v41 = vpop.f32.mrb[16].mxu1  ;;  %v2310_v15 = vld [vmem:[#allocation2 + $0x194] ss:$8 sps:$4 sm:$0xff]   ;;  %1411 = vmatpush1.bf16.msra.mxu1 %v2356_v6  ;;  %v2313_v33 = vld [vmem:[#allocation2 + $0x1a4] ss:$8 sps:$4 sm:$0xff]  }
 0x128   :  { %v271_v30 = vadd.f32 %v270_v26, %v2664_v61  ;;  %v272_v31 = vpop.f32.mrb[17].mxu0  ;;  %1039 = vmatprep.subr.bf16.mxu0 %v2301_v4  ;;  %v384_v46 = vadd.f32 %v383_v41, %v2600_v10  ;;  %v385_v47 = vpop.f32.mrb[17].mxu1  ;;  %v2361_v4 = vld [vmem:[#allocation4 + $0xa4] ss:$8 sps:$4 sm:$0xff]  }
 0x129   :  { %v273_v34 = vadd.f32 %v272_v31, %v2669_v63  ;;  %v274_v35 = vpop.f32.mrb[18].mxu0  ;;  %976 = vmatprep.mubr.bf16.mxu0 %v499_v25  ;;  %v386_v52 = vadd.f32 %v385_v47, %v2672_v1  ;;  %v387_v53 = vpop.f32.mrb[18].mxu1  ;;  %v2359_v25 = vld [vmem:[#allocation4 + $0xa0] ss:$8 sps:$4 sm:$0xff]   ;;  %1412 = vmatprep.subr.bf16.mxu1 %v2361_v4  ;;  %v2314_v4 = vld [vmem:[#allocation2 + $0x1b0] ss:$8 sps:$4 sm:$0xff]  }
 0x12a   :  { %v275_v37 = vadd.f32 %v274_v35, %v2664_v61  ;;  %v276_v38 = vpop.f32.mrb[19].mxu0  ;;  %977 = vmatmul.mubr.bf16.gmra.mrb[44].mxu0 %v498_v20  ;;  %v454_v49 = vmax.f32 %v271_v30, 0.0  ;;  %v456_v57 = vmax.f32 %v384_v46, 0.0  ;;  %v388_v58 = vadd.f32 %v387_v53, %v2600_v10  ;;  %v389_v0 = vpop.f32.mrb[19].mxu1  ;;  %v2364_v30 = vld [vmem:[#allocation4 + $0xb4] ss:$8 sps:$4 sm:$0xff]  }
 0x12b   :  { %v277_v44 = vadd.f32 %v276_v38, %v2669_v63  ;;  %1040 = vmatpush1.bf16.msra.mxu0 %v2299_v27  ;;  %v455_v54 = vmax.f32 %v273_v34, 0.0  ;;  %v457_v3 = vmax.f32 %v386_v52, 0.0  ;;  %v390_v5 = vadd.f32 %v389_v0, %v2672_v1  ;;  %v2308_v27 = vld [vmem:[#allocation2 + $0x190] ss:$8 sps:$4 sm:$0xff]   ;;  %1413 = vmatpush1.bf16.msra.mxu1 %v2359_v25  ;;  %v2367_v53 = vld [vmem:[#allocation4 + $0xc4] ss:$8 sps:$4 sm:$0xff]  }
 0x12c   :  { %v458_v50 = vmax.f32 %v275_v37, 0.0  ;;  %1041 = vmatprep.subr.bf16.mxu0 %v2304_v32  ;;  %v460_v12 = vmax.f32 %v388_v58, 0.0  ;;  %1414 = vmatprep.subr.bf16.mxu1 %v2364_v30 }
 0x12d   :  { %v459_v55 = vmax.f32 %v277_v44, 0.0  ;;  %v461_v16 = vmax.f32 %v390_v5, 0.0 }
 0x12e   :  { %v502_v2 = vpack.c.bf16 %v458_v50, %v454_v49  ;;  %v2732_v19 = vpack.c.bf16 %v460_v12, %v456_v57  ;;  %v2316_v57 = vld [vmem:[#allocation2 + $0x1b4] ss:$8 sps:$4 sm:$0xff]  }
 0x12f   :  { %v503_v7 = vpack.c.bf16 %v459_v55, %v455_v54  ;;  %1042 = vmatpush1.bf16.msra.mxu0 %v2302_v45  ;;  %v280_v8 = vpop.f32.mrb[20].mxu0  ;;  %v2735_v23 = vpack.c.bf16 %v461_v16, %v457_v3  ;;  %v393_v24 = vpop.f32.mrb[20].mxu1  ;;  %1415 = vmatpush1.bf16.msra.mxu1 %v2362_v48 }
 0x130   :  { %v281_v13 = vadd.f32 %v280_v8, %v2664_v61  ;;  %v282_v14 = vpop.f32.mrb[21].mxu0  ;;  %1043 = vmatprep.subr.bf16.mxu0 %v2307_v51  ;;  %v394_v28 = vadd.f32 %v393_v24, %v2600_v10  ;;  %v395_v29 = vpop.f32.mrb[21].mxu1  ;;  %v2311_v51 = vld [vmem:[#allocation2 + $0x1a0] ss:$8 sps:$4 sm:$0xff]   ;;  %1416 = vmatprep.subr.bf16.mxu1 %v2367_v53  ;;  %v2320_v53 = vld [vmem:[#allocation2 + $0x1d0] ss:$8 sps:$4 sm:$0xff]  }
 0x131   :  { %v283_v9 = vadd.f32 %v282_v14, %v2669_v63  ;;  %v284_v17 = vpop.f32.mrb[22].mxu0  ;;  %986 = vmatprep.mubr.bf16.mxu0 %v503_v7  ;;  %v396_v34 = vadd.f32 %v395_v29, %v2672_v1  ;;  %v397_v35 = vpop.f32.mrb[22].mxu1 }
 0x132   :  { %v285_v20 = vadd.f32 %v284_v17, %v2664_v61  ;;  %v286_v22 = vpop.f32.mrb[23].mxu0  ;;  %987 = vmatmul.mubr.bf16.gmra.mrb[48].mxu0 %v502_v2  ;;  %v462_v31 = vmax.f32 %v281_v13, 0.0  ;;  %v464_v41 = vmax.f32 %v394_v28, 0.0  ;;  %v398_v42 = vadd.f32 %v397_v35, %v2600_v10  ;;  %v399_v44 = vpop.f32.mrb[23].mxu1  ;;  %v2319_v17 = vld [vmem:[#allocation2 + $0x1c4] ss:$8 sps:$4 sm:$0xff]  }
 0x133   :  { %v287_v26 = vadd.f32 %v286_v22, %v2669_v63  ;;  %1044 = vmatpush1.bf16.msra.mxu0 %v2305_v11  ;;  %v463_v37 = vmax.f32 %v283_v9, 0.0  ;;  %v465_v46 = vmax.f32 %v396_v34, 0.0  ;;  %v400_v47 = vadd.f32 %v399_v44, %v2672_v1  ;;  %v2365_v11 = vld [vmem:[#allocation4 + $0xc0] ss:$8 sps:$4 sm:$0xff]  }
 0x134   :  { %v466_v32 = vmax.f32 %v285_v20, 0.0  ;;  %1045 = vmatprep.subr.bf16.mxu0 %v2310_v15  ;;  %v468_v52 = vmax.f32 %v398_v42, 0.0  ;;  %v2370_v15 = vld [vmem:[#allocation4 + $0xd4] ss:$8 sps:$4 sm:$0xff]   ;;  %1417 = vmatpush1.bf16.msra.mxu1 %v2365_v11  ;;  %v2317_v35 = vld [vmem:[#allocation2 + $0x1c0] ss:$8 sps:$4 sm:$0xff]  }
 0x135   :  { %v467_v38 = vmax.f32 %v287_v26, 0.0  ;;  %v469_v58 = vmax.f32 %v400_v47, 0.0  ;;  %1418 = vmatprep.subr.bf16.mxu1 %v2370_v15  ;;  %v2322_v42 = vld [vmem:[#allocation2 + $0x1d4] ss:$8 sps:$4 sm:$0xff]   ;;  %v2323_v15 = vld [vmem:[#allocation2 + $0x1e0] ss:$8 sps:$4 sm:$0xff]  }
 0x136   :  { %v506_v45 = vpack.c.bf16 %v466_v32, %v462_v31  ;;  %v2744_v3 = vpack.c.bf16 %v468_v52, %v464_v41  ;;  %v2368_v32 = vld [vmem:[#allocation4 + $0xd0] ss:$8 sps:$4 sm:$0xff]  }
 0x137   :  { %v507_v49 = vpack.c.bf16 %v467_v38, %v463_v37  ;;  %1046 = vmatpush1.bf16.msra.mxu0 %v2308_v27  ;;  %v290_v50 = vpop.f32.mrb[24].mxu0  ;;  %v2747_v7 = vpack.c.bf16 %v469_v58, %v465_v46  ;;  %v403_v8 = vpop.f32.mrb[24].mxu1 }
 0x138   :  { %v291_v54 = vadd.f32 %v290_v50, %v2664_v61  ;;  %v292_v55 = vpop.f32.mrb[25].mxu0  ;;  %1047 = vmatprep.subr.bf16.mxu0 %v2313_v33  ;;  %v404_v13 = vadd.f32 %v403_v8, %v2600_v10  ;;  %v405_v14 = vpop.f32.mrb[25].mxu1  ;;  %1419 = vmatpush1.bf16.msra.mxu1 %v2368_v32 }
 0x139   :  { %v293_v0 = vadd.f32 %v292_v55, %v2669_v63  ;;  %v294_v2 = vpop.f32.mrb[26].mxu0  ;;  %996 = vmatprep.mubr.bf16.mxu0 %v507_v49  ;;  %v406_v20 = vadd.f32 %v405_v14, %v2672_v1  ;;  %v407_v22 = vpop.f32.mrb[26].mxu1 }
 0x13a   :  { %v295_v5 = vadd.f32 %v294_v2, %v2664_v61  ;;  %v296_v6 = vpop.f32.mrb[27].mxu0  ;;  %997 = vmatmul.mubr.bf16.gmra.mrb[52].mxu0 %v506_v45  ;;  %v470_v16 = vmax.f32 %v291_v54, 0.0  ;;  %v472_v26 = vmax.f32 %v404_v13, 0.0  ;;  %v408_v27 = vadd.f32 %v407_v22, %v2600_v10  ;;  %v409_v28 = vpop.f32.mrb[27].mxu1 }
 0x13b   :  { %v297_v12 = vadd.f32 %v296_v6, %v2669_v63  ;;  %1048 = vmatpush1.bf16.msra.mxu0 %v2311_v51  ;;  %v471_v24 = vmax.f32 %v293_v0, 0.0  ;;  %v473_v30 = vmax.f32 %v406_v20, 0.0  ;;  %v410_v31 = vadd.f32 %v409_v28, %v2672_v1  ;;  %v2325_v0 = vld [vmem:[#allocation2 + $0x1e4] ss:$8 sps:$4 sm:$0xff]  }
 0x13c   :  { %v474_v9 = vmax.f32 %v295_v5, 0.0  ;;  %1049 = vmatprep.subr.bf16.mxu0 %v2316_v57  ;;  %v476_v37 = vmax.f32 %v408_v27, 0.0 }
 0x13d   :  { %v475_v25 = vmax.f32 %v297_v12, 0.0  ;;  %v477_v44 = vmax.f32 %v410_v31, 0.0 }
 0x13e   :  { %v510_v29 = vpack.c.bf16 %v474_v9, %v470_v16  ;;  %v512_v47 = vpack.c.bf16 %v476_v37, %v472_v26  ;;  %v2328_v9 = vld [vmem:[#allocation2 + $0x1f4] ss:$8 sps:$4 sm:$0xff]  }
 0x13f   :  { %v511_v33 = vpack.c.bf16 %v475_v25, %v471_v24  ;;  %1050 = vmatpush1.bf16.msra.mxu0 %v2314_v4  ;;  %v300_v34 = vpop.f32.mrb[28].mxu0  ;;  %v513_v50 = vpack.c.bf16 %v477_v44, %v473_v30  ;;  %v413_v51 = vpop.f32.mrb[28].mxu1  ;;  %v2326_v24 = vld [vmem:[#allocation2 + $0x1f0] ss:$8 sps:$4 sm:$0xff]  }
 0x140   :  { %v301_v38 = vadd.f32 %v300_v34, %v2664_v61  ;;  %v302_v41 = vpop.f32.mrb[29].mxu0  ;;  %1051 = vmatprep.subr.bf16.mxu0 %v2319_v17  ;;  %v414_v54 = vadd.f32 %v413_v51, %v2600_v10  ;;  %v415_v55 = vpop.f32.mrb[29].mxu1  ;;  %v2378_v34 = vld [vmem:[%s3108_s7] sm:$0xff]  }
 0x141   :  { %v303_v45 = vadd.f32 %v302_v41, %v2669_v63  ;;  %v304_v46 = vpop.f32.mrb[30].mxu0  ;;  %1006 = vmatprep.mubr.bf16.mxu0 %v511_v33  ;;  %v416_v2 = vadd.f32 %v415_v55, %v2672_v1  ;;  %v417_v5 = vpop.f32.mrb[30].mxu1 }
 0x142   :  { %v305_v48 = vadd.f32 %v304_v46, %v2664_v61  ;;  %v306_v49 = vpop.f32.mrb[31].mxu0  ;;  %1007 = vmatmul.mubr.bf16.gmra.mrb[56].mxu0 %v510_v29  ;;  %v478_v57 = vmax.f32 %v301_v38, 0.0  ;;  %v480_v8 = vmax.f32 %v414_v54, 0.0  ;;  %v418_v11 = vadd.f32 %v417_v5, %v2600_v10  ;;  %v419_v12 = vpop.f32.mrb[31].mxu1  ;;  %v2373_v10 = vld [vmem:[#allocation4 + $0xe4] ss:$8 sps:$4 sm:$0xff]  }
 0x143   :  { %v307_v52 = vadd.f32 %v306_v49, %v2669_v63  ;;  %1052 = vmatpush1.bf16.msra.mxu0 %v2317_v35  ;;  %v479_v61 = vmax.f32 %v303_v45, 0.0  ;;  %v481_v63 = vmax.f32 %v416_v2, 0.0  ;;  %v420_v13 = vadd.f32 %v419_v12, %v2672_v1  ;;  %v2371_v1 = vld [vmem:[#allocation4 + $0xe0] ss:$8 sps:$4 sm:$0xff]   ;;  %1420 = vmatprep.subr.bf16.mxu1 %v2373_v10  ;;  %v2383_v2 = vld [vmem:[%s3108_s7 + $0x58] sm:$0xff]  }
 0x144   :  { %v482_v58 = vmax.f32 %v305_v48, 0.0  ;;  %1053 = vmatprep.subr.bf16.mxu0 %v2322_v42  ;;  %v484_v16 = vmax.f32 %v418_v11, 0.0  ;;  %1421 = vmatpush1.bf16.msra.mxu1 %v2371_v1  ;;  %v2379_v38 = vld [vmem:[%s3108_s7 + $0x48] sm:$0xff]   ;;  %v2384_v12 = vld [vmem:[%s3108_s7 + $0x18] sm:$0xff]  }
 0x145   :  { %v483_v6 = vmax.f32 %v307_v52, 0.0  ;;  %v485_v17 = vmax.f32 %v420_v13, 0.0  ;;  %v2385_v13 = vld [vmem:[%s3108_s7 + $0x60] sm:$0xff]   ;;  %v2387_v10 = vld [vmem:[%s3108_s7 + $0x68] sm:$0xff]  }
 0x146   :  { %v514_v4 = vpack.c.bf16 %v482_v58, %v478_v57  ;;  %v516_v20 = vpack.c.bf16 %v484_v16, %v480_v8  ;;  %v2382_v57 = vld [vmem:[%s3108_s7 + $0x10] sm:$0xff]  }
 0x147   :  { %v515_v14 = vpack.c.bf16 %v483_v6, %v479_v61  ;;  %1054 = vmatpush1.bf16.msra.mxu0 %v2320_v53  ;;  %v517_v22 = vpack.c.bf16 %v485_v17, %v481_v63 }
 0x148   :  { %1055 = vmatprep.subr.bf16.mxu0 %v2325_v0 }
 0x149   :  { %1016 = vmatprep.mubr.bf16.mxu0 %v515_v14 }
 0x14a   :  { %1017 = vmatmul.mubr.bf16.gmra.mrb[60].mxu0 %v514_v4 }
 0x14b   :  { %1056 = vmatpush1.bf16.msra.mxu0 %v2323_v15  ;;  %1059 = vmatprep.mubr.bf16.mxu0 %v2687_v43  ;;  %v2374_v43 = vld [vmem:[#allocation4 + $0xf0] ss:$8 sps:$4 sm:$0xff]  }
 0x14c   :  { %1057 = vmatprep.subr.bf16.mxu0 %v2328_v9 }
 0x14f   :  { %1058 = vmatpush1.bf16.msra.mxu0 %v2326_v24 }
 0x152   :  { %1060 = vmatmul.mubr.bf16.vlgmr.msra.gmra.mrb[32].mxu0 %v2684_v40  ;;  %v2376_v40 = vld [vmem:[#allocation4 + $0xf4] ss:$8 sps:$4 sm:$0xff]  }
 0x153   :  { %1069 = vmatprep.mubr.bf16.mxu0 %v2699_v21  ;;  %1422 = vmatprep.subr.bf16.mxu1 %v2376_v40  ;;  %v582_v21 = vld [vmem:[%s3105_s4] sm:$0x3] }
 0x154   :  { %1423 = vmatpush1.bf16.msra.mxu1 %v2374_v43 }
 0x15a   :  { %1070 = vmatmul.mubr.bf16.gmra.mrb[36].mxu0 %v2696_v18  ;;  %v2377_v18 = vld [vmem:[%s3108_s7 + $0x40] sm:$0xff]  }
 0x15b   :  { %1079 = vmatprep.mubr.bf16.mxu0 %v2711_v62  ;;  %2090 = vmatprep.subr.bf16.mxu1 %v2377_v18  ;;  %v2784_v62 = vrot.slane %v582_v21, %v2660_v60 }
 0x162   :  { %1080 = vmatmul.mubr.bf16.gmra.mrb[40].mxu0 %v2708_v56  ;;  %v2781_v56 = vrot.slane %v582_v21, %v2657_v59 }
 0x163   :  { %1089 = vmatprep.mubr.bf16.mxu0 %v2723_v39 }
 0x16a   :  { %1090 = vmatmul.mubr.bf16.gmra.mrb[44].mxu0 %v2720_v36 }
 0x16b   :  { %1099 = vmatprep.mubr.bf16.mxu0 %v2735_v23 }
 0x172   :  { %1100 = vmatmul.mubr.bf16.gmra.mrb[48].mxu0 %v2732_v19 }
 0x173   :  { %1109 = vmatprep.mubr.bf16.mxu0 %v2747_v7 }
 0x17a   :  { %1110 = vmatmul.mubr.bf16.gmra.mrb[52].mxu0 %v2744_v3 }
 0x17b   :  { %1119 = vmatprep.mubr.bf16.mxu0 %v513_v50  ;;  %v2381_v50 = vld [vmem:[%s3108_s7 + $0x50] sm:$0xff]  }
 0x182   :  { %1120 = vmatmul.mubr.bf16.gmra.mrb[56].mxu0 %v512_v47  ;;  %v2380_v47 = vld [vmem:[%s3108_s7 + $0x8] sm:$0xff]  }
 0x183   :  { %1129 = vmatprep.mubr.bf16.mxu0 %v517_v22 }
 0x18a   :  { %1130 = vmatmul.mubr.bf16.gmra.mrb[60].mxu0 %v516_v20  ;;  %v2386_v20 = vld [vmem:[%s3108_s7 + $0x20] sm:$0xff]  }
 0x225   :  { %v1061_v36 = vpop.f32.mrb[32].mxu0 }
 0x226   :  { %v2154_v39 = vadd.f32 %v1061_v36, %v2781_v56  ;;  %v1063_v19 = vpop.f32.mrb[33].mxu0  ;;  %v2388_v36 = vld [vmem:[%s3108_s7 + $0x28] sm:$0xff]  }
 0x227   :  { %v2155_v23 = vadd.f32 %v1063_v19, %v2784_v62  ;;  %v1065_v3 = vpop.f32.mrb[34].mxu0 }
 0x228   :  { %v2156_v7 = vadd.f32 %v1065_v3, %v2781_v56  ;;  %v1067_v25 = vpop.f32.mrb[35].mxu0  ;;  %v1140_v27 = vmax.f32 %v2154_v39, 0.0 }
 0x229   :  { %v2157_v26 = vadd.f32 %v1067_v25, %v2784_v62  ;;  %v1141_v29 = vmax.f32 %v2155_v23, 0.0  ;;  %v2389_v23 = vld [vmem:[%s3108_s7 + $0x70] sm:$0xff]  }
 0x22a   :  { %v1142_v28 = vmax.f32 %v2156_v7, 0.0 }
 0x22b   :  { %v1143_v30 = vmax.f32 %v2157_v26, 0.0 }
 0x22c   :  { %v1172_v31 = vpack.c.bf16 %v1142_v28, %v1140_v27  ;;  %v2390_v28 = vld [vmem:[%s3108_s7 + $0x30] sm:$0xff]  }
 0x22d   :  { %v1173_v32 = vpack.c.bf16 %v1143_v30, %v1141_v29  ;;  %v1071_v33 = vpop.f32.mrb[36].mxu0 }
 0x22e   :  { %v2158_v35 = vadd.f32 %v1071_v33, %v2781_v56  ;;  %v1073_v37 = vpop.f32.mrb[37].mxu0 }
 0x22f   :  { %v2159_v41 = vadd.f32 %v1073_v37, %v2784_v62  ;;  %v1075_v42 = vpop.f32.mrb[38].mxu0  ;;  %1424 = vmatprep.mubr.bf16.mxu1 %v1173_v32 }
 0x230   :  { %v2160_v44 = vadd.f32 %v1075_v42, %v2781_v56  ;;  %v1077_v45 = vpop.f32.mrb[39].mxu0  ;;  %1425 = vmatmul.mubr.bf16.vlgmr.msra.gmra.mrb[32].mxu1 %v1172_v31  ;;  %v1144_v48 = vmax.f32 %v2158_v35, 0.0 }
 0x231   :  { %v2161_v46 = vadd.f32 %v1077_v45, %v2784_v62  ;;  %2091 = vmatpush3.bf16.msra.mxu1 %v2378_v34  ;;  %v1145_v51 = vmax.f32 %v2159_v41, 0.0 }
 0x232   :  { %v1146_v49 = vmax.f32 %v2160_v44, 0.0  ;;  %2092 = vmatprep.subr.bf16.mxu1 %v2379_v38 }
 0x233   :  { %v1147_v52 = vmax.f32 %v2161_v46, 0.0 }
 0x234   :  { %v1174_v53 = vpack.c.bf16 %v1146_v49, %v1144_v48 }
 0x235   :  { %v1175_v54 = vpack.c.bf16 %v1147_v52, %v1145_v51  ;;  %v1081_v55 = vpop.f32.mrb[40].mxu0  ;;  %2093 = vmatpush3.bf16.msra.mxu1 %v2380_v47 }
 0x236   :  { %v2162_v58 = vadd.f32 %v1081_v55, %v2781_v56  ;;  %v1083_v0 = vpop.f32.mrb[41].mxu0  ;;  %2094 = vmatprep.subr.bf16.mxu1 %v2381_v50 }
 0x237   :  { %v2163_v5 = vadd.f32 %v1083_v0, %v2784_v62  ;;  %v1085_v61 = vpop.f32.mrb[42].mxu0  ;;  %1434 = vmatprep.mubr.bf16.mxu1 %v1175_v54 }
 0x238   :  { %v2164_v6 = vadd.f32 %v1085_v61, %v2781_v56  ;;  %v1087_v8 = vpop.f32.mrb[43].mxu0  ;;  %1435 = vmatmul.mubr.bf16.gmra.mrb[36].mxu1 %v1174_v53  ;;  %v1148_v4 = vmax.f32 %v2162_v58, 0.0 }
 0x239   :  { %v2165_v11 = vadd.f32 %v1087_v8, %v2784_v62  ;;  %2095 = vmatpush3.bf16.msra.mxu1 %v2382_v57  ;;  %v1149_v14 = vmax.f32 %v2163_v5, 0.0 }
 0x23a   :  { %v1150_v63 = vmax.f32 %v2164_v6, 0.0  ;;  %2096 = vmatprep.subr.bf16.mxu1 %v2383_v2 }
 0x23b   :  { %v1151_v15 = vmax.f32 %v2165_v11, 0.0 }
 0x23c   :  { %v1176_v16 = vpack.c.bf16 %v1150_v63, %v1148_v4 }
 0x23d   :  { %v1177_v9 = vpack.c.bf16 %v1151_v15, %v1149_v14  ;;  %v1091_v17 = vpop.f32.mrb[44].mxu0  ;;  %2097 = vmatpush3.bf16.msra.mxu1 %v2384_v12 }
 0x23e   :  { %v2166_v22 = vadd.f32 %v1091_v17, %v2781_v56  ;;  %v1093_v24 = vpop.f32.mrb[45].mxu0  ;;  %2098 = vmatprep.subr.bf16.mxu1 %v2385_v13 }
 0x23f   :  { %v2167_v1 = vadd.f32 %v1093_v24, %v2784_v62  ;;  %v1095_v40 = vpop.f32.mrb[46].mxu0  ;;  %1444 = vmatprep.mubr.bf16.mxu1 %v1177_v9 }
 0x240   :  { %v2168_v43 = vadd.f32 %v1095_v40, %v2781_v56  ;;  %v1097_v18 = vpop.f32.mrb[47].mxu0  ;;  %1445 = vmatmul.mubr.bf16.gmra.mrb[40].mxu1 %v1176_v16  ;;  %v1152_v39 = vmax.f32 %v2166_v22, 0.0 }
 0x241   :  { %v2169_v21 = vadd.f32 %v1097_v18, %v2784_v62  ;;  %2099 = vmatpush3.bf16.msra.mxu1 %v2386_v20  ;;  %v1153_v3 = vmax.f32 %v2167_v1, 0.0 }
 0x242   :  { %v1154_v19 = vmax.f32 %v2168_v43, 0.0  ;;  %2100 = vmatprep.subr.bf16.mxu1 %v2387_v10 }
 0x243   :  { %v1155_v7 = vmax.f32 %v2169_v21, 0.0 }
 0x244   :  { %v1178_v25 = vpack.c.bf16 %v1154_v19, %v1152_v39 }
 0x245   :  { %v1179_v26 = vpack.c.bf16 %v1155_v7, %v1153_v3  ;;  %v1101_v27 = vpop.f32.mrb[48].mxu0  ;;  %2101 = vmatpush3.bf16.msra.mxu1 %v2388_v36  ;;  %v2391_v7 = vld [vmem:[%s3108_s7 + $0x78] sm:$0xff]  }
 0x246   :  { %v2170_v29 = vadd.f32 %v1101_v27, %v2781_v56  ;;  %v1103_v30 = vpop.f32.mrb[49].mxu0  ;;  %2102 = vmatprep.subr.bf16.mxu1 %v2389_v23 }
 0x247   :  { %v2171_v31 = vadd.f32 %v1103_v30, %v2784_v62  ;;  %v1105_v32 = vpop.f32.mrb[50].mxu0  ;;  %1454 = vmatprep.mubr.bf16.mxu1 %v1179_v26 }
 0x248   :  { %v2172_v33 = vadd.f32 %v1105_v32, %v2781_v56  ;;  %v1107_v34 = vpop.f32.mrb[51].mxu0  ;;  %1455 = vmatmul.mubr.bf16.gmra.mrb[44].mxu1 %v1178_v25  ;;  %v1156_v37 = vmax.f32 %v2170_v29, 0.0 }
 0x249   :  { %v2173_v35 = vadd.f32 %v1107_v34, %v2784_v62  ;;  %2103 = vmatpush3.bf16.msra.mxu1 %v2390_v28  ;;  %v1157_v41 = vmax.f32 %v2171_v31, 0.0 }
 0x24a   :  { %v1158_v38 = vmax.f32 %v2172_v33, 0.0  ;;  %2104 = vmatprep.subr.bf16.mxu1 %v2391_v7 }
 0x24b   :  { %v1159_v42 = vmax.f32 %v2173_v35, 0.0 }
 0x24c   :  { %v1180_v44 = vpack.c.bf16 %v1158_v38, %v1156_v37 }
 0x24d   :  { %v1181_v45 = vpack.c.bf16 %v1159_v42, %v1157_v41  ;;  %v1111_v46 = vpop.f32.mrb[52].mxu0 }
 0x24e   :  { %v2174_v47 = vadd.f32 %v1111_v46, %v2781_v56  ;;  %v1113_v48 = vpop.f32.mrb[53].mxu0 }
 0x24f   :  { %v2175_v49 = vadd.f32 %v1113_v48, %v2784_v62  ;;  %v1115_v50 = vpop.f32.mrb[54].mxu0  ;;  %1464 = vmatprep.mubr.bf16.mxu1 %v1181_v45 }
 0x250   :  { %v2176_v51 = vadd.f32 %v1115_v50, %v2781_v56  ;;  %v1117_v52 = vpop.f32.mrb[55].mxu0  ;;  %1465 = vmatmul.mubr.bf16.gmra.mrb[48].mxu1 %v1180_v44  ;;  %v1160_v54 = vmax.f32 %v2174_v47, 0.0 }
 0x251   :  { %v2177_v53 = vadd.f32 %v1117_v52, %v2784_v62  ;;  %v1161_v57 = vmax.f32 %v2175_v49, 0.0 }
 0x252   :  { %v1162_v55 = vmax.f32 %v2176_v51, 0.0 }
 0x253   :  { %v1163_v58 = vmax.f32 %v2177_v53, 0.0 }
 0x254   :  { %v1182_v0 = vpack.c.bf16 %v1162_v55, %v1160_v54 }
 0x255   :  { %v1183_v2 = vpack.c.bf16 %v1163_v58, %v1161_v57  ;;  %v1121_v5 = vpop.f32.mrb[56].mxu0 }
 0x256   :  { %v2178_v61 = vadd.f32 %v1121_v5, %v2781_v56  ;;  %v1123_v6 = vpop.f32.mrb[57].mxu0 }
 0x257   :  { %v2179_v8 = vadd.f32 %v1123_v6, %v2784_v62  ;;  %v1125_v11 = vpop.f32.mrb[58].mxu0  ;;  %1474 = vmatprep.mubr.bf16.mxu1 %v1183_v2 }
 0x258   :  { %v2180_v12 = vadd.f32 %v1125_v11, %v2781_v56  ;;  %v1127_v4 = vpop.f32.mrb[59].mxu0  ;;  %1475 = vmatmul.mubr.bf16.gmra.mrb[52].mxu1 %v1182_v0  ;;  %v1164_v13 = vmax.f32 %v2178_v61, 0.0 }
 0x259   :  { %v2181_v63 = vadd.f32 %v1127_v4, %v2784_v62  ;;  %v1165_v15 = vmax.f32 %v2179_v8, 0.0 }
 0x25a   :  { %v1166_v14 = vmax.f32 %v2180_v12, 0.0 }
 0x25b   :  { %v1167_v16 = vmax.f32 %v2181_v63, 0.0 }
 0x25c   :  { %v1184_v9 = vpack.c.bf16 %v1166_v14, %v1164_v13 }
 0x25d   :  { %v1185_v17 = vpack.c.bf16 %v1167_v16, %v1165_v15  ;;  %v1131_v20 = vpop.f32.mrb[60].mxu0 }
 0x25e   :  { %v2182_v22 = vadd.f32 %v1131_v20, %v2781_v56  ;;  %v1133_v24 = vpop.f32.mrb[61].mxu0 }
 0x25f   :  { %v2183_v10 = vadd.f32 %v1133_v24, %v2784_v62  ;;  %v1135_v1 = vpop.f32.mrb[62].mxu0  ;;  %1484 = vmatprep.mubr.bf16.mxu1 %v1185_v17 }
 0x260   :  { %v2184_v40 = vadd.f32 %v1135_v1, %v2781_v56  ;;  %v1137_v43 = vpop.f32.mrb[63].mxu0  ;;  %1485 = vmatmul.mubr.bf16.gmra.mrb[56].mxu1 %v1184_v9  ;;  %v1168_v21 = vmax.f32 %v2182_v22, 0.0  ;;  %v2392_v56 = vld [vmem:[%s3108_s7 + $0x38] sm:$0xff]  }
 0x261   :  { %v2185_v18 = vadd.f32 %v1137_v43, %v2784_v62  ;;  %v1169_v39 = vmax.f32 %v2183_v10, 0.0  ;;  %2105 = vmatpush3.bf16.msra.mxu1 %v2392_v56  ;;  %v1220_v62 = vld [vmem:[%s3107_s6] sm:$0x3] }
 0x262   :  { %v1170_v36 = vmax.f32 %v2184_v40, 0.0  ;;  %v2867_v25 = vrot.slane %v1220_v62, %v2657_v59  ;;  %v2870_v26 = vrot.slane %v1220_v62, %v2660_v60 }
 0x263   :  { %v1171_v19 = vmax.f32 %v2185_v18, 0.0 }
 0x264   :  { %v1186_v23 = vpack.c.bf16 %v1170_v36, %v1168_v21 }
 0x265   :  { %v1187_v3 = vpack.c.bf16 %v1171_v19, %v1169_v39 }
 0x267   :  { %1494 = vmatprep.mubr.bf16.mxu1 %v1187_v3 }
 0x268   :  { %1495 = vmatmul.mubr.bf16.gmra.mrb[60].mxu1 %v1186_v23 }
 0x303   :  { %v1426_v27 = vpop.f32.mrb[32].mxu1 }
 0x304   :  { %v1427_v28 = vadd.f32 %v1426_v27, %v2867_v25  ;;  %v1428_v29 = vpop.f32.mrb[33].mxu1 }
 0x305   :  { %v1429_v30 = vadd.f32 %v1428_v29, %v2870_v26  ;;  %v1430_v31 = vpop.f32.mrb[34].mxu1 }
 0x306   :  { %v1431_v32 = vadd.f32 %v1430_v31, %v2867_v25  ;;  %v1432_v33 = vpop.f32.mrb[35].mxu1  ;;  %v1505_v35 = vmax.f32 %v1427_v28, 0.0 }
 0x307   :  { %v1433_v34 = vadd.f32 %v1432_v33, %v2870_v26  ;;  %v1506_v38 = vmax.f32 %v1429_v30, 0.0 }
 0x308   :  { %v1507_v37 = vmax.f32 %v1431_v32, 0.0 }
 0x309   :  { %v1508_v59 = vmax.f32 %v1433_v34, 0.0 }
 0x30a   :  { %v1537_v41 = vpack.c.bf16 %v1507_v37, %v1505_v35 }
 0x30b   :  { %v1538_v42 = vpack.c.bf16 %v1508_v59, %v1506_v38  ;;  %v1436_v60 = vpop.f32.mrb[36].mxu1 }
 0x30c   :  { %v1437_v44 = vadd.f32 %v1436_v60, %v2867_v25  ;;  %v1438_v45 = vpop.f32.mrb[37].mxu1 }
 0x30d   :  { %v1439_v46 = vadd.f32 %v1438_v45, %v2870_v26  ;;  %v1440_v47 = vpop.f32.mrb[38].mxu1  ;;  %1720 = vmatprep.mubr.bf16.mxu1 %v1538_v42 }
 0x30e   :  { %v1441_v48 = vadd.f32 %v1440_v47, %v2867_v25  ;;  %v1442_v49 = vpop.f32.mrb[39].mxu1  ;;  %1721 = vmatmul.mubr.bf16.vlgmr.msra.gmra.mrb[64].mxu1 %v1537_v41  ;;  %v1509_v51 = vmax.f32 %v1437_v44, 0.0 }
 0x30f   :  { %v1443_v50 = vadd.f32 %v1442_v49, %v2870_v26  ;;  %v1510_v53 = vmax.f32 %v1439_v46, 0.0 }
 0x310   :  { %v1511_v52 = vmax.f32 %v1441_v48, 0.0 }
 0x311   :  { %v1512_v54 = vmax.f32 %v1443_v50, 0.0 }
 0x312   :  { %v1539_v55 = vpack.c.bf16 %v1511_v52, %v1509_v51 }
 0x313   :  { %v1540_v57 = vpack.c.bf16 %v1512_v54, %v1510_v53  ;;  %v1446_v58 = vpop.f32.mrb[40].mxu1 }
 0x314   :  { %v1447_v0 = vadd.f32 %v1446_v58, %v2867_v25  ;;  %v1448_v2 = vpop.f32.mrb[41].mxu1 }
 0x315   :  { %v1449_v5 = vadd.f32 %v1448_v2, %v2870_v26  ;;  %v1450_v61 = vpop.f32.mrb[42].mxu1  ;;  %1728 = vmatprep.mubr.bf16.mxu1 %v1540_v57 }
 0x316   :  { %v1451_v6 = vadd.f32 %v1450_v61, %v2867_v25  ;;  %v1452_v8 = vpop.f32.mrb[43].mxu1  ;;  %1729 = vmatmul.mubr.bf16.gmra.mrb[68].mxu1 %v1539_v55  ;;  %v1513_v12 = vmax.f32 %v1447_v0, 0.0 }
 0x317   :  { %v1453_v11 = vadd.f32 %v1452_v8, %v2870_v26  ;;  %v1514_v63 = vmax.f32 %v1449_v5, 0.0 }
 0x318   :  { %v1515_v4 = vmax.f32 %v1451_v6, 0.0 }
 0x319   :  { %v1516_v13 = vmax.f32 %v1453_v11, 0.0 }
 0x31a   :  { %v1541_v14 = vpack.c.bf16 %v1515_v4, %v1513_v12 }
 0x31b   :  { %v1542_v15 = vpack.c.bf16 %v1516_v13, %v1514_v63  ;;  %v1456_v16 = vpop.f32.mrb[44].mxu1 }
 0x31c   :  { %v1457_v9 = vadd.f32 %v1456_v16, %v2867_v25  ;;  %v1458_v17 = vpop.f32.mrb[45].mxu1 }
 0x31d   :  { %v1459_v20 = vadd.f32 %v1458_v17, %v2870_v26  ;;  %v1460_v22 = vpop.f32.mrb[46].mxu1  ;;  %1736 = vmatprep.mubr.bf16.mxu1 %v1542_v15 }
 0x31e   :  { %v1461_v24 = vadd.f32 %v1460_v22, %v2867_v25  ;;  %v1462_v10 = vpop.f32.mrb[47].mxu1  ;;  %1737 = vmatmul.mubr.bf16.gmra.mrb[72].mxu1 %v1541_v14  ;;  %v1517_v40 = vmax.f32 %v1457_v9, 0.0 }
 0x31f   :  { %v1463_v1 = vadd.f32 %v1462_v10, %v2870_v26  ;;  %v1518_v18 = vmax.f32 %v1459_v20, 0.0 }
 0x320   :  { %v1519_v43 = vmax.f32 %v1461_v24, 0.0 }
 0x321   :  { %v1520_v21 = vmax.f32 %v1463_v1, 0.0 }
 0x322   :  { %v1543_v36 = vpack.c.bf16 %v1519_v43, %v1517_v40 }
 0x323   :  { %v1544_v39 = vpack.c.bf16 %v1520_v21, %v1518_v18  ;;  %v1466_v19 = vpop.f32.mrb[48].mxu1  ;;  %v2907_v18 = vld [vmem:[%s3109_s8] ss:$0 sm:$0xff] }
 0x324   :  { %v1467_v23 = vadd.f32 %v1466_v19, %v2867_v25  ;;  %v1468_v3 = vpop.f32.mrb[49].mxu1 }
 0x325   :  { %v1469_v7 = vadd.f32 %v1468_v3, %v2870_v26  ;;  %v1470_v56 = vpop.f32.mrb[50].mxu1  ;;  %1744 = vmatprep.mubr.bf16.mxu1 %v1544_v39 }
 0x326   :  { %v1471_v62 = vadd.f32 %v1470_v56, %v2867_v25  ;;  %v1472_v27 = vpop.f32.mrb[51].mxu1  ;;  %1745 = vmatmul.mubr.bf16.gmra.mrb[76].mxu1 %v1543_v36  ;;  %v1521_v29 = vmax.f32 %v1467_v23, 0.0 }
 0x327   :  { %v1473_v28 = vadd.f32 %v1472_v27, %v2870_v26  ;;  %v1522_v31 = vmax.f32 %v1469_v7, 0.0 }
 0x328   :  { %v1523_v30 = vmax.f32 %v1471_v62, 0.0 }
 0x329   :  { %v1524_v32 = vmax.f32 %v1473_v28, 0.0 }
 0x32a   :  { %v1545_v33 = vpack.c.bf16 %v1523_v30, %v1521_v29 }
 0x32b   :  { %v1546_v34 = vpack.c.bf16 %v1524_v32, %v1522_v31  ;;  %v1476_v35 = vpop.f32.mrb[52].mxu1 }
 0x32c   :  { %v1477_v37 = vadd.f32 %v1476_v35, %v2867_v25  ;;  %v1478_v38 = vpop.f32.mrb[53].mxu1 }
 0x32d   :  { %v1479_v59 = vadd.f32 %v1478_v38, %v2870_v26  ;;  %v1480_v41 = vpop.f32.mrb[54].mxu1  ;;  %1752 = vmatprep.mubr.bf16.mxu1 %v1546_v34 }
 0x32e   :  { %v1481_v42 = vadd.f32 %v1480_v41, %v2867_v25  ;;  %v1482_v60 = vpop.f32.mrb[55].mxu1  ;;  %1753 = vmatmul.mubr.bf16.gmra.mrb[80].mxu1 %v1545_v33  ;;  %v1525_v45 = vmax.f32 %v1477_v37, 0.0 }
 0x32f   :  { %v1483_v44 = vadd.f32 %v1482_v60, %v2870_v26  ;;  %v1526_v47 = vmax.f32 %v1479_v59, 0.0 }
 0x330   :  { %v1527_v46 = vmax.f32 %v1481_v42, 0.0 }
 0x331   :  { %v1528_v48 = vmax.f32 %v1483_v44, 0.0 }
 0x332   :  { %v1547_v49 = vpack.c.bf16 %v1527_v46, %v1525_v45 }
 0x333   :  { %v1548_v50 = vpack.c.bf16 %v1528_v48, %v1526_v47  ;;  %v1486_v51 = vpop.f32.mrb[56].mxu1 }
 0x334   :  { %v1487_v52 = vadd.f32 %v1486_v51, %v2867_v25  ;;  %v1488_v53 = vpop.f32.mrb[57].mxu1 }
 0x335   :  { %v1489_v54 = vadd.f32 %v1488_v53, %v2870_v26  ;;  %v1490_v55 = vpop.f32.mrb[58].mxu1  ;;  %1760 = vmatprep.mubr.bf16.mxu1 %v1548_v50 }
 0x336   :  { %v1491_v57 = vadd.f32 %v1490_v55, %v2867_v25  ;;  %v1492_v58 = vpop.f32.mrb[59].mxu1  ;;  %1761 = vmatmul.mubr.bf16.gmra.mrb[84].mxu1 %v1547_v49  ;;  %v1529_v2 = vmax.f32 %v1487_v52, 0.0 }
 0x337   :  { %v1493_v0 = vadd.f32 %v1492_v58, %v2870_v26  ;;  %v1530_v61 = vmax.f32 %v1489_v54, 0.0 }
 0x338   :  { %v1531_v5 = vmax.f32 %v1491_v57, 0.0 }
 0x339   :  { %v1532_v6 = vmax.f32 %v1493_v0, 0.0 }
 0x33a   :  { %v1549_v8 = vpack.c.bf16 %v1531_v5, %v1529_v2 }
 0x33b   :  { %v1550_v11 = vpack.c.bf16 %v1532_v6, %v1530_v61  ;;  %v1496_v12 = vpop.f32.mrb[60].mxu1 }
 0x33c   :  { %v1497_v4 = vadd.f32 %v1496_v12, %v2867_v25  ;;  %v1498_v63 = vpop.f32.mrb[61].mxu1 }
 0x33d   :  { %v1499_v13 = vadd.f32 %v1498_v63, %v2870_v26  ;;  %v1500_v14 = vpop.f32.mrb[62].mxu1  ;;  %1768 = vmatprep.mubr.bf16.mxu1 %v1550_v11 }
 0x33e   :  { %v1501_v15 = vadd.f32 %v1500_v14, %v2867_v25  ;;  %v1502_v16 = vpop.f32.mrb[63].mxu1  ;;  %1769 = vmatmul.mubr.bf16.gmra.mrb[88].mxu1 %v1549_v8  ;;  %v1533_v17 = vmax.f32 %v1497_v4, 0.0 }
 0x33f   :  { %v1503_v9 = vadd.f32 %v1502_v16, %v2870_v26  ;;  %v1534_v22 = vmax.f32 %v1499_v13, 0.0 }
 0x340   :  { %v1535_v20 = vmax.f32 %v1501_v15, 0.0 }
 0x341   :  { %v1536_v24 = vmax.f32 %v1503_v9, 0.0 }
 0x342   :  { %v1551_v10 = vpack.c.bf16 %v1535_v20, %v1533_v17 }
 0x343   :  { %v1552_v1 = vpack.c.bf16 %v1536_v24, %v1534_v22 }
 0x345   :  { %1776 = vmatprep.mubr.bf16.mxu1 %v1552_v1 }
 0x346   :  { %1777 = vmatmul.mubr.bf16.gmra.mrb[92].mxu1 %v1551_v10 }
 0x3e1   :  { %v2106_v40 = vpop.f32.mrb[64].mxu1 }
 0x3e2   :  { %v2107_v43 = vpop.f32.mrb[65].mxu1 }
 0x3e3   :  { %v2108_v25 = vadd.f32 %v2107_v43, %v2106_v40  ;;  %v2109_v21 = vpop.f32.mrb[66].mxu1 }
 0x3e4   :  { %v2110_v36 = vpop.f32.mrb[67].mxu1 }
 0x3e5   :  { %v2111_v39 = vadd.f32 %v2110_v36, %v2109_v21  ;;  %v2910_v26 = vadd.f32 %v2108_v25, %v2907_v18 }
 0x3e7   :  { %1785 = vmax.xlane.f32.xlu0 %v2910_v26  ;;  %v2914_v23 = vadd.f32 %v2111_v39, %v2907_v18 }
 0x3e9   :  { %v2112_v19 = vpop.f32.mrb[68].mxu1 }
 0x3ea   :  { %v2113_v3 = vpop.f32.mrb[69].mxu1 }
 0x3eb   :  { %v2114_v7 = vadd.f32 %v2113_v3, %v2112_v19  ;;  %v2115_v56 = vpop.f32.mrb[70].mxu1  ;;  %1787 = vmax.xlane.f32.xlu0 %v2914_v23 }
 0x3ec   :  { %v2116_v62 = vpop.f32.mrb[71].mxu1 }
 0x3ed   :  { %v2117_v27 = vadd.f32 %v2116_v62, %v2115_v56  ;;  %v2918_v28 = vadd.f32 %v2114_v7, %v2907_v18 }
 0x3ef   :  { %1789 = vmax.xlane.f32.xlu1 %v2918_v28  ;;  %v2922_v30 = vadd.f32 %v2117_v27, %v2907_v18 }
 0x3f1   :  { %v2118_v29 = vpop.f32.mrb[72].mxu1 }
 0x3f2   :  { %v2119_v31 = vpop.f32.mrb[73].mxu1 }
 0x3f3   :  { %v2120_v32 = vadd.f32 %v2119_v31, %v2118_v29  ;;  %v2121_v33 = vpop.f32.mrb[74].mxu1  ;;  %1791 = vmax.xlane.f32.xlu1 %v2922_v30 }
 0x3f4   :  { %v2122_v34 = vpop.f32.mrb[75].mxu1 }
 0x3f5   :  { %v2123_v35 = vadd.f32 %v2122_v34, %v2121_v33  ;;  %v2926_v37 = vadd.f32 %v2120_v32, %v2907_v18 }
 0x3f7   :  { %1793 = vmax.xlane.f32.xlu0 %v2926_v37  ;;  %v2930_v38 = vadd.f32 %v2123_v35, %v2907_v18 }
 0x3f9   :  { %v2124_v59 = vpop.f32.mrb[76].mxu1  ;;  %1795 = vmax.xlane.f32.xlu1 %v2930_v38 }
 0x3fa   :  { %v2125_v41 = vpop.f32.mrb[77].mxu1 }
 0x3fb   :  { %v2126_v42 = vadd.f32 %v2125_v41, %v2124_v59  ;;  %v2127_v60 = vpop.f32.mrb[78].mxu1 }
 0x3fc   :  { %v2128_v44 = vpop.f32.mrb[79].mxu1 }
 0x3fd   :  { %v2129_v45 = vadd.f32 %v2128_v44, %v2127_v60  ;;  %v2934_v46 = vadd.f32 %v2126_v42, %v2907_v18 }
 0x3ff   :  { %1797 = vmax.xlane.f32.xlu0 %v2934_v46  ;;  %v2938_v47 = vadd.f32 %v2129_v45, %v2907_v18 }
 0x401   :  { %v2130_v48 = vpop.f32.mrb[80].mxu1  ;;  %1799 = vmax.xlane.f32.xlu1 %v2938_v47 }
 0x402   :  { %v2131_v49 = vpop.f32.mrb[81].mxu1 }
 0x403   :  { %v2132_v50 = vadd.f32 %v2131_v49, %v2130_v48  ;;  %v2133_v51 = vpop.f32.mrb[82].mxu1 }
 0x404   :  { %v2134_v52 = vpop.f32.mrb[83].mxu1 }
 0x405   :  { %v2135_v53 = vadd.f32 %v2134_v52, %v2133_v51  ;;  %v2942_v54 = vadd.f32 %v2132_v50, %v2907_v18 }
 0x407   :  { %1801 = vmax.xlane.f32.xlu0 %v2942_v54  ;;  %v2946_v55 = vadd.f32 %v2135_v53, %v2907_v18 }
 0x409   :  { %v2136_v57 = vpop.f32.mrb[84].mxu1  ;;  %1803 = vmax.xlane.f32.xlu1 %v2946_v55 }
 0x40a   :  { %v2137_v58 = vpop.f32.mrb[85].mxu1 }
 0x40b   :  { %v2138_v0 = vadd.f32 %v2137_v58, %v2136_v57  ;;  %v2139_v2 = vpop.f32.mrb[86].mxu1 }
 0x40c   :  { %v2140_v5 = vpop.f32.mrb[87].mxu1 }
 0x40d   :  { %v2141_v61 = vadd.f32 %v2140_v5, %v2139_v2  ;;  %v2950_v6 = vadd.f32 %v2138_v0, %v2907_v18 }
 0x40f   :  { %1805 = vmax.xlane.f32.xlu0 %v2950_v6  ;;  %v2954_v8 = vadd.f32 %v2141_v61, %v2907_v18 }
 0x411   :  { %v2142_v11 = vpop.f32.mrb[88].mxu1  ;;  %1807 = vmax.xlane.f32.xlu1 %v2954_v8 }
 0x412   :  { %v2143_v12 = vpop.f32.mrb[89].mxu1 }
 0x413   :  { %v2144_v4 = vadd.f32 %v2143_v12, %v2142_v11  ;;  %v2145_v63 = vpop.f32.mrb[90].mxu1 }
 0x414   :  { %v2146_v13 = vpop.f32.mrb[91].mxu1 }
 0x415   :  { %v2147_v14 = vadd.f32 %v2146_v13, %v2145_v63  ;;  %v2958_v15 = vadd.f32 %v2144_v4, %v2907_v18 }
 0x417   :  { %1809 = vmax.xlane.f32.xlu0 %v2958_v15  ;;  %v2962_v16 = vadd.f32 %v2147_v14, %v2907_v18 }
 0x419   :  { %v2148_v9 = vpop.f32.mrb[92].mxu1  ;;  %1811 = vmax.xlane.f32.xlu1 %v2962_v16 }
 0x41a   :  { %v2149_v17 = vpop.f32.mrb[93].mxu1 }
 0x41b   :  { %v2150_v20 = vadd.f32 %v2149_v17, %v2148_v9  ;;  %v2151_v22 = vpop.f32.mrb[94].mxu1 }
 0x41c   :  { %v2152_v24 = vpop.f32.mrb[95].mxu1 }
 0x41d   :  { %v2153_v10 = vadd.f32 %v2152_v24, %v2151_v22  ;;  %v2966_v1 = vadd.f32 %v2150_v20, %v2907_v18 }
 0x41f   :  { %1813 = vmax.xlane.f32.xlu0 %v2966_v1  ;;  %v2970_v40 = vadd.f32 %v2153_v10, %v2907_v18 }
 0x421   :  { %1815 = vmax.xlane.f32.xlu1 %v2970_v40 }
 0x474   :  { %v1786_v43 = vpop.xlane.xlu0 %1785 }
 0x475   :  { %v1817_v25 = vsub.f32 %v2910_v26, %v1786_v43 }
 0x477   :  { %v1833_v21 = vmul.f32 1.442695, %v1817_v25 }
 0x478   :  { %v1788_v36 = vpop.xlane.xlu0 %1787 }
 0x479   :  { %2393 = vpow2.f32 %v1833_v21  ;;  %v1818_v39 = vsub.f32 %v2914_v23, %v1788_v36 }
 0x47b   :  { %v1835_v19 = vmul.f32 1.442695, %v1818_v39 }
 0x47c   :  { %v1790_v3 = vpop.xlane.xlu1 %1789 }
 0x47d   :  { %2395 = vpow2.f32 %v1835_v19  ;;  %v1819_v7 = vsub.f32 %v2918_v28, %v1790_v3 }
 0x47f   :  { %v1837_v56 = vmul.f32 1.442695, %v1819_v7 }
 0x480   :  { %v1792_v62 = vpop.xlane.xlu1 %1791 }
 0x481   :  { %2397 = vpow2.f32 %v1837_v56  ;;  %v1820_v18 = vsub.f32 %v2922_v30, %v1792_v62 }
 0x483   :  { %v2977_v27 = vpop.eup %2393  ;;  %v1839_v29 = vmul.f32 1.442695, %v1820_v18 }
 0x484   :  { %1865 = vadd.xlane.f32.xlu0 %v2977_v27  ;;  %v1794_v26 = vpop.xlane.xlu0 %1793 }
 0x485   :  { %2399 = vpow2.f32 %v1839_v29  ;;  %v1821_v31 = vsub.f32 %v2926_v37, %v1794_v26 }
 0x486   :  { %v1796_v23 = vpop.xlane.xlu1 %1795 }
 0x487   :  { %v2981_v32 = vpop.eup %2395  ;;  %v1841_v33 = vmul.f32 1.442695, %v1821_v31  ;;  %v1822_v28 = vsub.f32 %v2930_v38, %v1796_v23 }
 0x488   :  { %1867 = vadd.xlane.f32.xlu1 %v2981_v32 }
 0x489   :  { %2401 = vpow2.f32 %v1841_v33  ;;  %v1843_v34 = vmul.f32 1.442695, %v1822_v28 }
 0x48b   :  { %v2985_v30 = vpop.eup %2397  ;;  %2403 = vpow2.f32 %v1843_v34 }
 0x48c   :  { %1869 = vadd.xlane.f32.xlu0 %v2985_v30  ;;  %v1798_v35 = vpop.xlane.xlu0 %1797 }
 0x48d   :  { %v1823_v59 = vsub.f32 %v2934_v46, %v1798_v35 }
 0x48e   :  { %v1800_v41 = vpop.xlane.xlu1 %1799 }
 0x48f   :  { %v2989_v37 = vpop.eup %2399  ;;  %v1845_v42 = vmul.f32 1.442695, %v1823_v59  ;;  %v1824_v60 = vsub.f32 %v2938_v47, %v1800_v41 }
 0x490   :  { %1871 = vadd.xlane.f32.xlu1 %v2989_v37 }
 0x491   :  { %2405 = vpow2.f32 %v1845_v42  ;;  %v1847_v38 = vmul.f32 1.442695, %v1824_v60 }
 0x493   :  { %v2993_v44 = vpop.eup %2401  ;;  %2407 = vpow2.f32 %v1847_v38 }
 0x494   :  { %1873 = vadd.xlane.f32.xlu0 %v2993_v44  ;;  %v1802_v45 = vpop.xlane.xlu0 %1801 }
 0x495   :  { %v2996_v48 = vpop.eup %2403  ;;  %v1825_v46 = vsub.f32 %v2942_v54, %v1802_v45 }
 0x496   :  { %v1804_v49 = vpop.xlane.xlu1 %1803  ;;  %1875 = vadd.xlane.f32.xlu1 %v2996_v48 }
 0x497   :  { %v1849_v50 = vmul.f32 1.442695, %v1825_v46  ;;  %v1826_v47 = vsub.f32 %v2946_v55, %v1804_v49 }
 0x499   :  { %2409 = vpow2.f32 %v1849_v50  ;;  %v1851_v51 = vmul.f32 1.442695, %v1826_v47 }
 0x49b   :  { %v3001_v52 = vpop.eup %2405  ;;  %2411 = vpow2.f32 %v1851_v51 }
 0x49c   :  { %1877 = vadd.xlane.f32.xlu0 %v3001_v52  ;;  %v1806_v53 = vpop.xlane.xlu0 %1805 }
 0x49d   :  { %v3004_v57 = vpop.eup %2407  ;;  %v1827_v58 = vsub.f32 %v2950_v6, %v1806_v53 }
 0x49e   :  { %v1808_v0 = vpop.xlane.xlu1 %1807  ;;  %1879 = vadd.xlane.f32.xlu1 %v3004_v57 }
 0x49f   :  { %v1853_v54 = vmul.f32 1.442695, %v1827_v58  ;;  %v1828_v2 = vsub.f32 %v2954_v8, %v1808_v0 }
 0x4a1   :  { %2413 = vpow2.f32 %v1853_v54  ;;  %v1855_v55 = vmul.f32 1.442695, %v1828_v2 }
 0x4a3   :  { %v3009_v5 = vpop.eup %2409  ;;  %2415 = vpow2.f32 %v1855_v55 }
 0x4a4   :  { %1881 = vadd.xlane.f32.xlu0 %v3009_v5  ;;  %v1810_v61 = vpop.xlane.xlu0 %1809 }
 0x4a5   :  { %v3012_v11 = vpop.eup %2411  ;;  %v1829_v12 = vsub.f32 %v2958_v15, %v1810_v61 }
 0x4a6   :  { %v1812_v4 = vpop.xlane.xlu1 %1811  ;;  %1883 = vadd.xlane.f32.xlu1 %v3012_v11 }
 0x4a7   :  { %v1857_v6 = vmul.f32 1.442695, %v1829_v12  ;;  %v1830_v63 = vsub.f32 %v2962_v16, %v1812_v4 }
 0x4a9   :  { %2417 = vpow2.f32 %v1857_v6  ;;  %v1859_v8 = vmul.f32 1.442695, %v1830_v63 }
 0x4ab   :  { %v3017_v13 = vpop.eup %2413  ;;  %2419 = vpow2.f32 %v1859_v8 }
 0x4ac   :  { %1885 = vadd.xlane.f32.xlu0 %v3017_v13  ;;  %v1814_v14 = vpop.xlane.xlu0 %1813 }
 0x4ad   :  { %v3020_v9 = vpop.eup %2415  ;;  %v1831_v17 = vsub.f32 %v2966_v1, %v1814_v14 }
 0x4ae   :  { %v1816_v20 = vpop.xlane.xlu1 %1815  ;;  %1887 = vadd.xlane.f32.xlu1 %v3020_v9 }
 0x4af   :  { %v1861_v15 = vmul.f32 1.442695, %v1831_v17  ;;  %v1832_v22 = vsub.f32 %v2970_v40, %v1816_v20 }
 0x4b1   :  { %2421 = vpow2.f32 %v1861_v15  ;;  %v1863_v16 = vmul.f32 1.442695, %v1832_v22 }
 0x4b3   :  { %v3025_v24 = vpop.eup %2417  ;;  %2423 = vpow2.f32 %v1863_v16 }
 0x4b4   :  { %1889 = vadd.xlane.f32.xlu0 %v3025_v24 }
 0x4b5   :  { %v3028_v10 = vpop.eup %2419 }
 0x4b6   :  { %1891 = vadd.xlane.f32.xlu1 %v3028_v10 }
 0x4bb   :  { %v3031_v43 = vpop.eup %2421 }
 0x4bc   :  { %1893 = vadd.xlane.f32.xlu0 %v3031_v43 }
 0x4bd   :  { %v3034_v1 = vpop.eup %2423 }
 0x4be   :  { %1895 = vadd.xlane.f32.xlu1 %v3034_v1 }
 0x511   :  { %v1866_v40 = vpop.xlane.xlu0 %1865 }
 0x512   :  { %2425 = vrcp.f32 %v1866_v40 }
 0x515   :  { %v1868_v25 = vpop.xlane.xlu1 %1867 }
 0x516   :  { %2427 = vrcp.f32 %v1868_v25 }
 0x519   :  { %v1870_v21 = vpop.xlane.xlu0 %1869 }
 0x51a   :  { %2429 = vrcp.f32 %v1870_v21 }
 0x51c   :  { %v2426_v36 = vpop.eup %2425 }
 0x51d   :  { %v1913_v39 = vmul.f32 %v2426_v36, %v2977_v27  ;;  %v1872_v19 = vpop.xlane.xlu1 %1871 }
 0x51e   :  { %2431 = vrcp.f32 %v1872_v19 }
 0x51f   :  { %1929 = vst [vmem:[%s3110_s9] sm:$0xff] %v1913_v39 }
 0x520   :  { %v2428_v3 = vpop.eup %2427 }
 0x521   :  { %v1914_v7 = vmul.f32 %v2428_v3, %v2981_v32  ;;  %v1874_v56 = vpop.xlane.xlu0 %1873 }
 0x522   :  { %2433 = vrcp.f32 %v1874_v56 }
 0x523   :  { %1930 = vst [vmem:[%s3110_s9 + $0x8] sm:$0xff] %v1914_v7  ;;  %v1876_v62 = vpop.xlane.xlu1 %1875 }
 0x524   :  { %v2430_v18 = vpop.eup %2429  ;;  %2435 = vrcp.f32 %v1876_v62 }
 0x525   :  { %v1915_v27 = vmul.f32 %v2430_v18, %v2985_v30 }
 0x527   :  { %1931 = vst [vmem:[%s3110_s9 + $0x10] sm:$0xff] %v1915_v27 }
 0x528   :  { %v2432_v29 = vpop.eup %2431 }
 0x529   :  { %v1916_v26 = vmul.f32 %v2432_v29, %v2989_v37  ;;  %v1878_v31 = vpop.xlane.xlu0 %1877 }
 0x52a   :  { %2437 = vrcp.f32 %v1878_v31 }
 0x52b   :  { %1932 = vst [vmem:[%s3110_s9 + $0x18] sm:$0xff] %v1916_v26  ;;  %v1880_v23 = vpop.xlane.xlu1 %1879 }
 0x52c   :  { %v2434_v32 = vpop.eup %2433  ;;  %2439 = vrcp.f32 %v1880_v23 }
 0x52d   :  { %v1917_v33 = vmul.f32 %v2434_v32, %v2993_v44 }
 0x52e   :  { %v2436_v28 = vpop.eup %2435 }
 0x52f   :  { %1933 = vst [vmem:[%s3110_s9 + $0x20] sm:$0xff] %v1917_v33  ;;  %v1918_v34 = vmul.f32 %v2436_v28, %v2996_v48 }
 0x531   :  { %1934 = vst [vmem:[%s3110_s9 + $0x28] sm:$0xff] %v1918_v34  ;;  %v1882_v30 = vpop.xlane.xlu0 %1881 }
 0x532   :  { %2441 = vrcp.f32 %v1882_v30 }
 0x533   :  { %v1884_v35 = vpop.xlane.xlu1 %1883 }
 0x534   :  { %v2438_v59 = vpop.eup %2437  ;;  %2443 = vrcp.f32 %v1884_v35 }
 0x535   :  { %v1919_v41 = vmul.f32 %v2438_v59, %v3001_v52 }
 0x536   :  { %v2440_v37 = vpop.eup %2439 }
 0x537   :  { %1935 = vst [vmem:[%s3110_s9 + $0x30] sm:$0xff] %v1919_v41  ;;  %v1920_v42 = vmul.f32 %v2440_v37, %v3004_v57 }
 0x539   :  { %1936 = vst [vmem:[%s3110_s9 + $0x38] sm:$0xff] %v1920_v42  ;;  %v1886_v60 = vpop.xlane.xlu0 %1885 }
 0x53a   :  { %2445 = vrcp.f32 %v1886_v60 }
 0x53b   :  { %v1888_v38 = vpop.xlane.xlu1 %1887 }
 0x53c   :  { %v2442_v44 = vpop.eup %2441  ;;  %2447 = vrcp.f32 %v1888_v38 }
 0x53d   :  { %v1921_v45 = vmul.f32 %v2442_v44, %v3009_v5 }
 0x53e   :  { %v2444_v48 = vpop.eup %2443 }
 0x53f   :  { %1937 = vst [vmem:[%s3110_s9 + $0x40] sm:$0xff] %v1921_v45  ;;  %v1922_v46 = vmul.f32 %v2444_v48, %v3012_v11 }
 0x541   :  { %1938 = vst [vmem:[%s3110_s9 + $0x48] sm:$0xff] %v1922_v46  ;;  %v1890_v49 = vpop.xlane.xlu0 %1889 }
 0x542   :  { %2449 = vrcp.f32 %v1890_v49 }
 0x543   :  { %v1892_v50 = vpop.xlane.xlu1 %1891 }
 0x544   :  { %v2446_v47 = vpop.eup %2445  ;;  %2451 = vrcp.f32 %v1892_v50 }
 0x545   :  { %v1923_v51 = vmul.f32 %v2446_v47, %v3017_v13 }
 0x546   :  { %v2448_v52 = vpop.eup %2447 }
 0x547   :  { %1939 = vst [vmem:[%s3110_s9 + $0x50] sm:$0xff] %v1923_v51  ;;  %v1924_v53 = vmul.f32 %v2448_v52, %v3020_v9 }
 0x549   :  { %1940 = vst [vmem:[%s3110_s9 + $0x58] sm:$0xff] %v1924_v53  ;;  %v1894_v57 = vpop.xlane.xlu0 %1893 }
 0x54a   :  { %2453 = vrcp.f32 %v1894_v57 }
 0x54b   :  { %v1896_v58 = vpop.xlane.xlu1 %1895 }
 0x54c   :  { %v2450_v0 = vpop.eup %2449  ;;  %2455 = vrcp.f32 %v1896_v58 }
 0x54d   :  { %v1925_v54 = vmul.f32 %v2450_v0, %v3025_v24 }
 0x54e   :  { %v2452_v2 = vpop.eup %2451 }
 0x54f   :  { %1941 = vst [vmem:[%s3110_s9 + $0x60] sm:$0xff] %v1925_v54  ;;  %v1926_v55 = vmul.f32 %v2452_v2, %v3028_v10 }
 0x551   :  { %1942 = vst [vmem:[%s3110_s9 + $0x68] sm:$0xff] %v1926_v55 }
 0x554   :  { %v2454_v5 = vpop.eup %2453 }
 0x555   :  { %v1927_v61 = vmul.f32 %v2454_v5, %v3031_v43 }
 0x556   :  { %v2456_v11 = vpop.eup %2455 }
 0x557   :  { %1943 = vst [vmem:[%s3110_s9 + $0x70] sm:$0xff] %v1927_v61  ;;  %v1928_v12 = vmul.f32 %v2456_v11, %v3034_v1 }
 0x559   :  { %1944 = vst [vmem:[%s3110_s9 + $0x78] sm:$0xff] %v1928_v12 }
 0x55a   :  { %1949 = vsyncpa [#allocation3], 1 }
 0x55b   :  { %1950 = vsyncpa [#allocation5], 1 }

</bundles_post_ra>
